<compile_context>
chip_gen: v7x
topology: tpu7x:2x2x1
jax: 0.10.0
libtpu: 0.0.40
codegen_flags: <defaults>
</compile_context>

<pallas_src>
import functools

import jax
import jax.numpy as jnp
from jax import lax
from jax.experimental import pallas as pl
from jax.experimental.pallas import tpu as pltpu


def _shift_kernel(shift_ref, x_ref, o_ref, *, pad, C, H, W):
    """One image per grid step: replicate-pad by `pad` + integer-shift crop."""
    b = pl.program_id(0)
    sh = shift_ref[b, 0]          # height shift, int32 in [0, 2*pad]  (SMEM scalar)
    sw = shift_ref[b, 1]          # width  shift, int32 in [0, 2*pad]

    # One-hot row-selection matrix: sel_h[i, k] = 1 iff k == clip(i + sh - pad, 0, H-1)
    i_h = lax.broadcasted_iota(jnp.int32, (H, H), 0)
    k_h = lax.broadcasted_iota(jnp.int32, (H, H), 1)
    src_h = jnp.clip(i_h + (sh - pad), 0, H - 1)
    sel_h = jnp.where(k_h == src_h, 1.0, 0.0).astype(jnp.float32)

    # One-hot column-selection matrix (pre-transposed):
    #   sel_w[w, j] = 1 iff w == clip(j + sw - pad, 0, W-1)
    w_w = lax.broadcasted_iota(jnp.int32, (W, W), 0)
    j_w = lax.broadcasted_iota(jnp.int32, (W, W), 1)
    src_w = jnp.clip(j_w + (sw - pad), 0, W - 1)
    sel_w = jnp.where(w_w == src_w, 1.0, 0.0).astype(jnp.float32)

    # One-hot f32 matmuls copy pixel values exactly (products are v*1 or v*0);
    # HIGHEST precision avoids any single-pass bf16 rounding of the pixel values.
    for c in range(C):  # C is small and static -> unrolled
        img = x_ref[0, c].astype(jnp.float32)                                # (H, W)
        rows = jnp.dot(sel_h, img,
                       preferred_element_type=jnp.float32,
                       precision=lax.Precision.HIGHEST)                      # rows[i,:] = img[src_h[i], :]
        o_ref[0, c] = jnp.dot(rows, sel_w,
                              preferred_element_type=jnp.float32,
                              precision=lax.Precision.HIGHEST)               # out[:,j] = rows[:, src_w[j]]


def shift_crop_pallas(x, shifts, pad):
    """x: (B, C, H, W); shifts: (B, 2) int32 in [0, 2*pad]. Returns float32 (B, C, H, W)."""
    B, C, H, W = x.shape
    kernel = functools.partial(_shift_kernel, pad=pad, C=C, H=H, W=W)
    return pl.pallas_call(
        kernel,
        out_shape=jax.ShapeDtypeStruct((B, C, H, W), jnp.float32),
        grid_spec=pltpu.PrefetchScalarGridSpec(
            num_scalar_prefetch=1,
            grid=(B,),
            in_specs=[pl.BlockSpec((1, C, H, W), lambda b, s: (b, 0, 0, 0))],
            out_specs=pl.BlockSpec((1, C, H, W), lambda b, s: (b, 0, 0, 0)),
        ),
        compiler_params=pltpu.CompilerParams(
            dimension_semantics=("parallel",),
        ),
    )(shifts, x)


def random_shifts_aug(x, key, *, img_size, modality="pixels"):
    """Pallas equivalent of RandomShiftsAug.forward."""
    pad = int(img_size / 21) if modality == "pixels" else None
    if not pad:
        return x
    orig_shape = None
    if x.ndim == 5:                       # (horizon, n, c, h, w) -> (horizon*n, c, h, w)
        orig_shape = x.shape
        x = x.reshape((-1,) + x.shape[2:])
    B, C, H, W = x.shape
    assert H == W
    # TODO(synk): uses JAX PRNG instead of torch.randint; same distribution, not bit-identical stream.
    shifts = jax.random.randint(key, (B, 2), 0, 2 * pad + 1, dtype=jnp.int32)
    out = shift_crop_pallas(x, shifts, pad)
    if orig_shape is not None:
        out = out.reshape(orig_shape)
    return out


def _reference(x, shifts, pad):
    """Pure-JAX reference: replicate pad + per-image integer crop (== the torch forward)."""
    xf = x.astype(jnp.float32)
    xp = jnp.pad(xf, ((0, 0), (0, 0), (pad, pad), (pad, pad)), mode="edge")
    C, H, W = x.shape[1], x.shape[2], x.shape[3]

    def crop_one(img, s):
        return lax.dynamic_slice(img, (0, s[0], s[1]), (C, H, W))

    return jax.vmap(crop_one)(xp, shifts)


if __name__ == "__main__":
    key = jax.random.PRNGKey(0)
    k_img, k_shift = jax.random.split(key)

    B, C, H, W = 2, 4, 32, 32            # img_size=32 -> pad = int(32/21) = 1 (pad>0 so the kernel runs)
    pad = int(H / 21)
    x = jax.random.normal(k_img, (B, C, H, W), dtype=jnp.float32)

    # Deterministic correctness check vs. pure-JAX reference, covering edge clamps.
    shifts = jnp.array([[0, 2 * pad], [2 * pad, 1]], dtype=jnp.int32)
    out = jax.block_until_ready(shift_crop_pallas(x, shifts, pad))
    ref = _reference(x, shifts, pad)
    assert out.shape == ref.shape
    assert out.dtype == jnp.float32
    assert bool(jnp.allclose(out, ref, atol=1e-5, rtol=1e-5))

    # Full module path (random per-image shifts, mirrors forward()), 4-D input.
    out_mod = jax.block_until_ready(random_shifts_aug(x, k_shift, img_size=H, modality="pixels"))
    assert out_mod.shape == (B, C, H, W)
    assert out_mod.dtype == jnp.float32

    # 5-D (horizon, n, c, h, w) path, mirrors the reshape branch of forward().
    x5 = x.reshape(2, 1, C, H, W)
    out5 = jax.block_until_ready(random_shifts_aug(x5, k_shift, img_size=H, modality="pixels"))
    assert out5.shape == x5.shape

    print("KERNEL_OK")
</pallas_src>

<mosaic_0001>
module attributes {stable_mosaic.version = 11 : i64} {
  func.func @_shift_kernel(%arg0: i32, %arg1: memref<2x2xi32, #tpu.memory_space<smem>>, %arg2: memref<1x4x32x32xf32, #tpu.memory_space<vmem>>, %arg3: memref<1x4x32x32xf32, #tpu.memory_space<vmem>>) attributes {dimension_semantics = [#tpu.dimension_semantics<parallel>], iteration_bounds = array<i64: 2>, scalar_prefetch = 1 : i64, scratch_operands = 0 : i64, tpu.core_type = #tpu.core_type<tc>, window_params = [{transform_indices = @transform_0, window_bounds = array<i64: 1, 4, 32, 32>}, {transform_indices = @transform_1, window_bounds = array<i64: 1, 4, 32, 32>}]} {
    %0 = arith.index_cast %arg0 : i32 to index
    %c0 = arith.constant 0 : index
    %1 = memref.load %arg1[%0, %c0] : memref<2x2xi32, #tpu.memory_space<smem>>
    %2 = arith.index_cast %arg0 : i32 to index
    %c1 = arith.constant 1 : index
    %3 = memref.load %arg1[%2, %c1] : memref<2x2xi32, #tpu.memory_space<smem>>
    %4 = tpu.iota {dimensions = array<i32: 0>} : vector<32x32xi32>
    %5 = tpu.iota {dimensions = array<i32: 1>} : vector<32x32xi32>
    %c1_i32 = arith.constant 1 : i32
    %6 = arith.subi %1, %c1_i32 : i32
    %7 = vector.broadcast %6 : i32 to vector<32x32xi32>
    %8 = arith.addi %4, %7 : vector<32x32xi32>
    %c0_i32 = arith.constant 0 : i32
    %c31_i32 = arith.constant 31 : i32
    %9 = vector.broadcast %c0_i32 : i32 to vector<32x32xi32>
    %10 = arith.maxsi %9, %8 : vector<32x32xi32>
    %11 = vector.broadcast %c31_i32 : i32 to vector<32x32xi32>
    %12 = arith.minsi %11, %10 : vector<32x32xi32>
    %13 = arith.cmpi eq, %5, %12 : vector<32x32xi32>
    %cst = arith.constant 1.000000e+00 : f32
    %cst_0 = arith.constant 0.000000e+00 : f32
    %14 = vector.broadcast %cst : f32 to vector<32x32xf32>
    %15 = vector.broadcast %cst_0 : f32 to vector<32x32xf32>
    %16 = arith.select %13, %14, %15 : vector<32x32xi1>, vector<32x32xf32>
    %17 = tpu.iota {dimensions = array<i32: 0>} : vector<32x32xi32>
    %18 = tpu.iota {dimensions = array<i32: 1>} : vector<32x32xi32>
    %c1_i32_1 = arith.constant 1 : i32
    %19 = arith.subi %3, %c1_i32_1 : i32
    %20 = vector.broadcast %19 : i32 to vector<32x32xi32>
    %21 = arith.addi %18, %20 : vector<32x32xi32>
    %c0_i32_2 = arith.constant 0 : i32
    %c31_i32_3 = arith.constant 31 : i32
    %22 = vector.broadcast %c0_i32_2 : i32 to vector<32x32xi32>
    %23 = arith.maxsi %22, %21 : vector<32x32xi32>
    %24 = vector.broadcast %c31_i32_3 : i32 to vector<32x32xi32>
    %25 = arith.minsi %24, %23 : vector<32x32xi32>
    %26 = arith.cmpi eq, %17, %25 : vector<32x32xi32>
    %cst_4 = arith.constant 1.000000e+00 : f32
    %cst_5 = arith.constant 0.000000e+00 : f32
    %27 = vector.broadcast %cst_4 : f32 to vector<32x32xf32>
    %28 = vector.broadcast %cst_5 : f32 to vector<32x32xf32>
    %29 = arith.select %26, %27, %28 : vector<32x32xi1>, vector<32x32xf32>
    %c0_6 = arith.constant 0 : index
    %c0_7 = arith.constant 0 : index
    %c0_8 = arith.constant 0 : index
    %c0_9 = arith.constant 0 : index
    %30 = vector.load %arg2[%c0_6, %c0_7, %c0_8, %c0_9] : memref<1x4x32x32xf32, #tpu.memory_space<vmem>>, vector<1x1x32x32xf32>
    %31 = vector.shape_cast %30 : vector<1x1x32x32xf32> to vector<32x32xf32>
    %cst_10 = arith.constant dense<0.000000e+00> : vector<32x32xf32>
    %32 = tpu.matmul %16, %31, %cst_10 {dimension_numbers = #tpu.dot_dimension_numbers<[1], [0], [0], [1], [0, 0, 1, 1], [], []>, precision = #tpu.contract_precision<fp32>} : vector<32x32xf32>, vector<32x32xf32>, vector<32x32xf32> -> vector<32x32xf32>
    %cst_11 = arith.constant dense<0.000000e+00> : vector<32x32xf32>
    %33 = tpu.matmul %32, %29, %cst_11 {dimension_numbers = #tpu.dot_dimension_numbers<[1], [0], [0], [1], [0, 0, 1, 1], [], []>, precision = #tpu.contract_precision<fp32>} : vector<32x32xf32>, vector<32x32xf32>, vector<32x32xf32> -> vector<32x32xf32>
    %c0_12 = arith.constant 0 : index
    %c0_13 = arith.constant 0 : index
    %c0_14 = arith.constant 0 : index
    %c0_15 = arith.constant 0 : index
    %34 = vector.load %arg3[%c0_12, %c0_13, %c0_14, %c0_15] : memref<1x4x32x32xf32, #tpu.memory_space<vmem>>, vector<1x1x32x32xf32>
    %35 = vector.shape_cast %34 : vector<1x1x32x32xf32> to vector<32x32xf32>
    %36 = vector.shape_cast %33 : vector<32x32xf32> to vector<1x1x32x32xf32>
    tpu.vector_store %arg3[%c0_12, %c0_13, %c0_14, %c0_15], %36 {strides = array<i32>} : memref<1x4x32x32xf32, #tpu.memory_space<vmem>>, vector<1x1x32x32xf32>,
    %c0_16 = arith.constant 0 : index
    %c1_17 = arith.constant 1 : index
    %c0_18 = arith.constant 0 : index
    %c0_19 = arith.constant 0 : index
    %37 = vector.load %arg2[%c0_16, %c1_17, %c0_18, %c0_19] : memref<1x4x32x32xf32, #tpu.memory_space<vmem>>, vector<1x1x32x32xf32>
    %38 = vector.shape_cast %37 : vector<1x1x32x32xf32> to vector<32x32xf32>
    %cst_20 = arith.constant dense<0.000000e+00> : vector<32x32xf32>
    %39 = tpu.matmul %16, %38, %cst_20 {dimension_numbers = #tpu.dot_dimension_numbers<[1], [0], [0], [1], [0, 0, 1, 1], [], []>, precision = #tpu.contract_precision<fp32>} : vector<32x32xf32>, vector<32x32xf32>, vector<32x32xf32> -> vector<32x32xf32>
    %cst_21 = arith.constant dense<0.000000e+00> : vector<32x32xf32>
    %40 = tpu.matmul %39, %29, %cst_21 {dimension_numbers = #tpu.dot_dimension_numbers<[1], [0], [0], [1], [0, 0, 1, 1], [], []>, precision = #tpu.contract_precision<fp32>} : vector<32x32xf32>, vector<32x32xf32>, vector<32x32xf32> -> vector<32x32xf32>
    %c0_22 = arith.constant 0 : index
    %c1_23 = arith.constant 1 : index
    %c0_24 = arith.constant 0 : index
    %c0_25 = arith.constant 0 : index
    %41 = vector.load %arg3[%c0_22, %c1_23, %c0_24, %c0_25] : memref<1x4x32x32xf32, #tpu.memory_space<vmem>>, vector<1x1x32x32xf32>
    %42 = vector.shape_cast %41 : vector<1x1x32x32xf32> to vector<32x32xf32>
    %43 = vector.shape_cast %40 : vector<32x32xf32> to vector<1x1x32x32xf32>
    tpu.vector_store %arg3[%c0_22, %c1_23, %c0_24, %c0_25], %43 {strides = array<i32>} : memref<1x4x32x32xf32, #tpu.memory_space<vmem>>, vector<1x1x32x32xf32>,
    %c0_26 = arith.constant 0 : index
    %c2 = arith.constant 2 : index
    %c0_27 = arith.constant 0 : index
    %c0_28 = arith.constant 0 : index
    %44 = vector.load %arg2[%c0_26, %c2, %c0_27, %c0_28] : memref<1x4x32x32xf32, #tpu.memory_space<vmem>>, vector<1x1x32x32xf32>
    %45 = vector.shape_cast %44 : vector<1x1x32x32xf32> to vector<32x32xf32>
    %cst_29 = arith.constant dense<0.000000e+00> : vector<32x32xf32>
    %46 = tpu.matmul %16, %45, %cst_29 {dimension_numbers = #tpu.dot_dimension_numbers<[1], [0], [0], [1], [0, 0, 1, 1], [], []>, precision = #tpu.contract_precision<fp32>} : vector<32x32xf32>, vector<32x32xf32>, vector<32x32xf32> -> vector<32x32xf32>
    %cst_30 = arith.constant dense<0.000000e+00> : vector<32x32xf32>
    %47 = tpu.matmul %46, %29, %cst_30 {dimension_numbers = #tpu.dot_dimension_numbers<[1], [0], [0], [1], [0, 0, 1, 1], [], []>, precision = #tpu.contract_precision<fp32>} : vector<32x32xf32>, vector<32x32xf32>, vector<32x32xf32> -> vector<32x32xf32>
    %c0_31 = arith.constant 0 : index
    %c2_32 = arith.constant 2 : index
    %c0_33 = arith.constant 0 : index
    %c0_34 = arith.constant 0 : index
    %48 = vector.load %arg3[%c0_31, %c2_32, %c0_33, %c0_34] : memref<1x4x32x32xf32, #tpu.memory_space<vmem>>, vector<1x1x32x32xf32>
    %49 = vector.shape_cast %48 : vector<1x1x32x32xf32> to vector<32x32xf32>
    %50 = vector.shape_cast %47 : vector<32x32xf32> to vector<1x1x32x32xf32>
    tpu.vector_store %arg3[%c0_31, %c2_32, %c0_33, %c0_34], %50 {strides = array<i32>} : memref<1x4x32x32xf32, #tpu.memory_space<vmem>>, vector<1x1x32x32xf32>,
    %c0_35 = arith.constant 0 : index
    %c3 = arith.constant 3 : index
    %c0_36 = arith.constant 0 : index
    %c0_37 = arith.constant 0 : index
    %51 = vector.load %arg2[%c0_35, %c3, %c0_36, %c0_37] : memref<1x4x32x32xf32, #tpu.memory_space<vmem>>, vector<1x1x32x32xf32>
    %52 = vector.shape_cast %51 : vector<1x1x32x32xf32> to vector<32x32xf32>
    %cst_38 = arith.constant dense<0.000000e+00> : vector<32x32xf32>
    %53 = tpu.matmul %16, %52, %cst_38 {dimension_numbers = #tpu.dot_dimension_numbers<[1], [0], [0], [1], [0, 0, 1, 1], [], []>, precision = #tpu.contract_precision<fp32>} : vector<32x32xf32>, vector<32x32xf32>, vector<32x32xf32> -> vector<32x32xf32>
    %cst_39 = arith.constant dense<0.000000e+00> : vector<32x32xf32>
    %54 = tpu.matmul %53, %29, %cst_39 {dimension_numbers = #tpu.dot_dimension_numbers<[1], [0], [0], [1], [0, 0, 1, 1], [], []>, precision = #tpu.contract_precision<fp32>} : vector<32x32xf32>, vector<32x32xf32>, vector<32x32xf32> -> vector<32x32xf32>
    %c0_40 = arith.constant 0 : index
    %c3_41 = arith.constant 3 : index
    %c0_42 = arith.constant 0 : index
    %c0_43 = arith.constant 0 : index
    %55 = vector.load %arg3[%c0_40, %c3_41, %c0_42, %c0_43] : memref<1x4x32x32xf32, #tpu.memory_space<vmem>>, vector<1x1x32x32xf32>
    %56 = vector.shape_cast %55 : vector<1x1x32x32xf32> to vector<32x32xf32>
    %57 = vector.shape_cast %54 : vector<32x32xf32> to vector<1x1x32x32xf32>
    tpu.vector_store %arg3[%c0_40, %c3_41, %c0_42, %c0_43], %57 {strides = array<i32>} : memref<1x4x32x32xf32, #tpu.memory_space<vmem>>, vector<1x1x32x32xf32>,
    return
  }
  func.func @transform_0(%arg0: i32, %arg1: memref<2x2xi32, #tpu.memory_space<smem>>) -> (i32, i32, i32, i32) {
    %c0_i32 = arith.constant 0 : i32
    %c0_i32_0 = arith.constant 0 : i32
    %c0_i32_1 = arith.constant 0 : i32
    %c0_i32_2 = arith.constant 0 : i32
    return %arg0, %c0_i32, %c0_i32_0, %c0_i32_1 : i32, i32, i32, i32
  }
  func.func @transform_1(%arg0: i32, %arg1: memref<2x2xi32, #tpu.memory_space<smem>>) -> (i32, i32, i32, i32) {
    %c0_i32 = arith.constant 0 : i32
    %c0_i32_0 = arith.constant 0 : i32
    %c0_i32_1 = arith.constant 0 : i32
    %c0_i32_2 = arith.constant 0 : i32
    return %arg0, %c0_i32, %c0_i32_0, %c0_i32_1 : i32, i32, i32, i32
  }
}

</mosaic_0001>

<bundles_post_ra>
// kernel: tpu_custom_call.1
= control target key start
LH: loop header
LB: loop body
LE: loop exit
PB: predicated region body
PF: predicated region fallthrough
CT: control target
= control target key end

     0   :  { %s8087_s0 = inlined_call_operand.hbm [shape: s32[2,2], index: 0, kind: input, shape index: {}]   ;;  %s8088_s1 = inlined_call_operand.hbm [shape: f32[2,4,32,32], index: 1, kind: input, shape index: {}]   ;;  %s8089_s2 = inlined_call_operand.hbm [shape: f32[2,4,32,32], index: 2, kind: output, shape index: {}]  }
   0x1   :  { %s6990_s11 = scalar_lea.hbm %s8087_s0, 32 }
   0x2   :  { %p6991_p0 = scmp.ne.s32.totalorder %s8087_s0, %s6990_s11  ;;  %p6994_p1 = scmp.lt.u32.totalorder %s6990_s11, %s8087_s0 }
   0x4   :  { %p6996_p2 = pnand %p6994_p1, %p6991_p0 }
   0x6   :  { %6999 = shalt.err (!%p6996_p2)  }
   0x7   :  { %s7100_s16 = smov [#allocation3]  }
   0x8   :  { %8 = dma.hbm_to_smem %s8087_s0, 32, %s7100_s16, [#allocation2] }
   0x9   :  { %7074 = dma.done.wait [#allocation2], 32 }
   0xa   :  { %7075 = vsyncadd [#allocation2], 4294967264 }
   0xb   :  { %10 = sfence }
   0xc   :  { %11 = vsyncpa [#allocation5], 0 }
   0xd   :  { %13 = vsyncpa [#allocation5 + $0x1], 0 }
   0xe   :  { %14 = vsyncpa [#allocation6], 0 }
   0xf   :  { %16 = vsyncpa [#allocation6 + $0x1], 0  ;;  %s7136_s19 = smov 0   ;;  %s7138_s20 = smov 0  }
  0x10   :  { %s7140_s21 = smov 0   ;;  %s7142_s22 = smov 0  }
  0x11 LB: > { %s7157_s0 = sadd.s32 4294967295, %s7098_s22   ;;  %s5198_s23 = sadd.s32 4294967294, %s7098_s22   ;;  %s7098_s22 = sphi %s7142_s22, %s8106_s22   ;;  %s7094_s21 = sphi %s7140_s21, %s8105_s21   ;;  %s7090_s20 = sphi %s7138_s20, %s8104_s20   ;;  %s7086_s19 = sphi %s7136_s19, %s8103_s19  }
  0x12   : > { %s7161_s24 = sadd.s32 1, %s7098_s22   ;;  %s29_s25 = sadd.s32 1, %s7094_s21 }
  0x13   : > { %s26_s26 = ssub.s32 %s7098_s22, %s7161_s24  ;;  %p36_p3 = scmp.ne.s32.totalorder %s7094_s21, %s7090_s20 }
  0x14   : > { %p27_p4 = scmp.eq.s32.totalorder %s26_s26, 0  ;;  %p37_p5 = scmp.eq.s32.totalorder %s7098_s22, 0 }
  0x15   : > { %p42_p6 = scmp.ne.s32.totalorder %s7090_s20, %s7086_s19  ;;  %p43_p7 = scmp.eq.s32.totalorder %s7157_s0, 0 }
  0x16   : > { %s7173_s27 = scalar_select %p27_p4, %s7094_s21, %s29_s25  }
  0x17   : > { %p7175_p8 = por %p37_p5, %p36_p3  ;;  %p7179_p9 = por %p43_p7, %p42_p6 }
  0x18   : > { %p66_p10 = scmp.eq.s32.totalorder %s7157_s0, 1  ;;  %p72_p11 = scmp.eq.s32.totalorder %s5198_s23, 1 }
  0x19   : > { %p6949_p13 = scmp.lt.s32.totalorder %s7098_s22, 2  ;;  %s92_s4 = sand.u32 1, %s7094_s21  }
  0x1a   : > { %p7186_p0 = por %p66_p10, %p36_p3  ;;  %p7190_p1 = por %p72_p11, %p42_p6 }
  0x1b   : > { %s5335_s5 = sshll.u32 %s7098_s22, 11  ;;  %s5201_s6 = sshll.u32 %s92_s4, 7 }
  0x1c   : > { %s8093_s30 = scalar_select %p7186_p0, 1, 0 }
  0x1d   : > { %s8094_s3 = scalar_select %p7190_p1, 1, 0 }
  0x1e   : > { %s7199_s9 = scalar_lea.hbm %s8088_s1, %s5335_s5  ;;  %s96_s10 = scalar_lea.vmem [#allocation4], %s5201_s6 }
  0x1f   : > { %s103_s11 = sshll.u32 %s96_s10, 4  ;;  %p7203_p2 = pnand %p6949_p13, %p7175_p8  ;;  %s7207_s11 = int_to_ptr.vmem [resolvable:$true] %s103_s11 }
  0x20   : > { %s7209_s13 = scalar_lea.sflag [#allocation5], %s92_s4  ;;  %s7000_s14 = scalar_lea.hbm %s7199_s9, 2048 }
  0x21   : > { %p7001_p3 = scmp.ne.s32.totalorder %s7199_s9, %s7000_s14  ;;  %p7002_p4 = pneg %p7203_p2 }
  0x22   : > { %s7005_s17 = scalar_lea.hbm %s8088_s1, 4096  ;;  %p7006_p7 = scmp.lt.u32.totalorder %s7199_s9, %s8088_s1 }
  0x23   : > { %p7003_p5 = pnand %p7002_p4, %p7001_p3  ;;  %p7007_p8 = scmp.lt.u32.totalorder %s7005_s17, %s7000_s14 }
  0x24   : > { %p7009_p11 = scmp.lt.u32.totalorder %s7000_s14, %s7199_s9 }
  0x25   : > { %p7004_p6 = pneg %p7003_p5  ;;  %p7008_p10 = por %p7007_p8, %p7006_p7 }
  0x27   : > { %p7010_p13 = por %p7009_p11, %p7008_p10 }
  0x29   : > { %p7011_p12 = pnand %p7010_p13, %p7004_p6 }
  0x2b   : > { %7014 = shalt.err (!%p7011_p12)
}
  0x2c   : > { %s7015_s25 = scalar_lea.vmem %s7207_s11, 2048  ;;  %s7101_s26 = smov [#allocation4]  }
  0x2d   : > { %p7016_p3 = scmp.ne.s32.totalorder %s7207_s11, %s7015_s25  ;;  %s7020_s28 = sshll.u32 %s7101_s26, 4  ;;  %s7021_s28 = int_to_ptr.vmem [resolvable:$false] %s7020_s28 }
  0x2e   : > { %s7022_s4 = scalar_lea.vmem %s7021_s28, 4096  ;;  %p7023_p0 = scmp.lt.s32.totalorder %s7207_s11, %s7021_s28 }
  0x2f   : > { %p7018_p5 = pnand %p7016_p3, %p7002_p4  ;;  %p7024_p7 = scmp.lt.s32.totalorder %s7022_s4, %s7015_s25 }
  0x31   : > { %p7019_p1 = pneg %p7018_p5  ;;  %p7025_p8 = por %p7024_p7, %p7023_p0 }
  0x33   : > { %p7026_p10 = pnand %p7025_p8, %p7019_p1 }
  0x35   : > { %7029 = shalt.err (!%p7026_p10)
}
  0x36   : > { %s7102_s5 = smov 128   ;;  %s7103_s6 = smov 8  }
  0x37   : > { %6944 = dma.hbm_to_vmem [thread:$0]  (!%p7203_p2), %s7199_s9, 2048, %s7207_s11, %s7209_s13, %s7102_s5, %s7102_s5, %s7103_s6  }
  0x38   : > { %p5204_p12 = scmp.ge.s32.totalorder %s7098_s22, 1  ;;  %p111_p4 = scmp.lt.s32.totalorder %s7098_s22, 3 }
  0x3a   : > { %p112_p6 = pnand %p5204_p12, %p111_p4 }
  0x3b   : > { %s7240_s7 = sand.u32 (!%p112_p6), 1, %s7090_s20  }
  0x3c   : > { %115 = sbr.rel (%p112_p6) target bundleno = 779 (0x30b), region = 24  ;;  %s5205_s8 = sshll.u32 (!%p112_p6), %s7240_s7, 7 }
  0x3d   : > { %s118_s10 = scalar_lea.sflag (!%p112_p6), [#allocation5], %s7240_s7  ;;  %s7246_s14 = scalar_lea.vmem (!%p112_p6), [#allocation4], %s5205_s8 }
  0x43   : > { %7077 = dma.done.wait (%p7179_p9), %s118_s10, 2048  }
  0x44   : > { %7079 = vsyncadd (%p7179_p9), %s118_s10, 4294965248  ;;  %s5207_s9 = sshll.u32 %s7157_s0, 7  ;;  %v144_v0 = vlaneseq  ;;  %vm200_vm0 = vcmask 261120   ;;  %v196_v4 = vld [vmem:[%s7246_s14] sm:$0xff]  ;;  %v197_v5 = vld [vmem:[%s7246_s14 + $0x8] sm:$0xff]  ;;  %v7104_v34 = vmov 0.0  }
  0x45   : > { %s141_s11 = sld [smem:[#allocation3 + %s5207_s9]]  ;;  %s142_s12 = sadd.s32 1, %s5207_s9  ;;  %v7263_v6 = vld [vmem:[%s7246_s14 + $0x10] sm:$0xff]  ;;  %v214_v9 = vand.u32 4294901760, %v196_v4  ;;  %v217_v10 = vand.u32 4294901760, %v197_v5  ;;  %v199_v11 = vld [vmem:[%s7246_s14 + $0x18] sm:$0xff] }
  0x46   : > { %s143_s13 = sld [smem:[#allocation3 + %s142_s12]]  ;;  %v7253_v1 = vshrl.u32 %v144_v0, 7  ;;  %v7258_v3 = vand.u32 127, %v144_v0  ;;  %v220_v12 = vand.u32 4294901760, %v7263_v6  ;;  %v223_v14 = vand.u32 4294901760, %v199_v11  ;;  %s8002_s16 = scalar_lea.vmem [#allocation7], %s5205_s8 }
  0x47   : > { %v7275_v18 = vpack.c.bf16 %v217_v10, %v214_v9  ;;  %v7277_v19 = vsub.f32 %v196_v4, %v214_v9  ;;  %v7279_v20 = vsub.f32 %v197_v5, %v217_v10  ;;  %s5336_s17 = sshll.u32 %s7157_s0, 11  ;;  %s5125_s18 = sshll.u32 %s8002_s16, 4  ;;  %s8039_s18 = int_to_ptr.vmem [resolvable:$true] %s5125_s18 }
  0x48   : > { %v7256_v2 = vadd.s32 8, %v7253_v1  ;;  %v7266_v7 = vadd.s32 16, %v7253_v1  ;;  %v7269_v8 = vadd.s32 24, %v7253_v1  ;;  %v7282_v22 = vpack.c.bf16 %v223_v14, %v220_v12  ;;  %s8037_s26 = scalar_lea.hbm %s8089_s2, %s5336_s17  ;;  %s5112_s0 = scalar_lea.sflag [#allocation6], %s7240_s7 }
  0x49   : > { %6394 = vmatprep.subr.bf16.mxu0 %v7275_v18  ;;  %v325_v25 = vand.u32 4294901760, %v7277_v19  ;;  %v332_v26 = vand.u32 4294901760, %v7279_v20  ;;  %v7339_v49 = vsub.f32 %v7263_v6, %v220_v12  ;;  %v345_v51 = vsub.f32 %v199_v11, %v223_v14  ;;  %s7030_s28 = scalar_lea.vmem %s8039_s18, 2048  ;;  %p8100_p0 = scmp.ne.s32.totalorder %s8093_s30, 0 }
  0x4a   : > { %6396 = vmatpush3.bf16.msra.mxu0 %v7275_v18  ;;  %v6409_v14 = vpack.c.bf16 %v7279_v20, %v7277_v19  ;;  %p7031_p9 = scmp.ne.s32.totalorder %s8039_s18, %s7030_s28  ;;  %s7106_s4 = smov [#allocation7]  }
  0x4b   : > { %s5208_s29 = sadd.s32 4294967295, %s141_s11  ;;  %6398 = vmatprep.subr.bf16.mxu0 %v7282_v22  ;;  %v326_v29 = vsub.f32 %v7277_v19, %v325_v25  ;;  %v333_v30 = vsub.f32 %v7279_v20, %v332_v26  ;;  %v339_v56 = vand.u32 4294901760, %v7339_v49  ;;  %v346_v58 = vand.u32 4294901760, %v345_v51  ;;  %s7034_s5 = sshll.u32 %s7106_s4, 4  ;;  %s7035_s5 = int_to_ptr.vmem [resolvable:$false] %s7034_s5 }
  0x4c   : > { %v152_v13 = vstv %s5208_s29  ;;  %s5209_s15 = sadd.s32 4294967295, %s143_s13  ;;  %p7032_p1 = pnand %p7031_p9, %p8100_p0 }
  0x4d   : > { %v153_v15 = vadd.s32 %v152_v13, %v7253_v1  ;;  %v182_v16 = vstv %s5209_s15  ;;  %v154_v17 = vadd.s32 %v152_v13, %v7256_v2  ;;  %v155_v23 = vadd.s32 %v152_v13, %v7266_v7  ;;  %s7036_s6 = scalar_lea.vmem %s7035_s5, 4096  ;;  %p7037_p11 = scmp.lt.s32.totalorder %s8039_s18, %s7035_s5 }
  0x4e   : > { %v183_v21 = vadd.s32 %v182_v16, %v7258_v3  ;;  %v327_v36 = vand.u32 4294901760, %v326_v29  ;;  %v334_v37 = vand.u32 4294901760, %v333_v30  ;;  %6400 = vmatpush3.bf16.msra.mxu0 %v7282_v22  ;;  %v156_v52 = vadd.s32 %v152_v13, %v7269_v8  ;;  %p7033_p2 = pneg %p7032_p1  ;;  %p7038_p13 = scmp.lt.s32.totalorder %s7036_s6, %s7030_s28 }
  0x4f   : > { %vm157_vm1 = vcmp.gt.s32.totalorder %v153_v15, 0  ;;  %vm159_vm2 = vcmp.gt.s32.totalorder %v154_v17, 0  ;;  %vm161_vm6 = vcmp.gt.s32.totalorder %v155_v23, 0  ;;  %v340_v61 = vsub.f32 %v7339_v49, %v339_v56 }
  0x50   : > { %v158_v24 = vsel %vm157_vm1, %v153_v15, 0  ;;  %v160_v27 = vsel %vm159_vm2, %v154_v17, 0  ;;  %vm184_vm5 = vcmp.gt.s32.totalorder %v183_v21, 0  ;;  %v162_v33 = vsel %vm161_vm6, %v155_v23, 0  ;;  %p7039_p3 = por %p7038_p13, %p7037_p11 }
  0x51   : > { %vm165_vm3 = vcmp.lt.s32.totalorder %v158_v24, 31  ;;  %vm167_vm4 = vcmp.lt.s32.totalorder %v160_v27, 31  ;;  %v185_v32 = vsel %vm184_vm5, %v183_v21, 0  ;;  %vm169_vm10 = vcmp.lt.s32.totalorder %v162_v33, 31 }
  0x52   : > { %v166_v28 = vsel %vm165_vm3, %v158_v24, 31  ;;  %v168_v31 = vsel %vm167_vm4, %v160_v27, 31  ;;  %vm186_vm9 = vcmp.lt.s32.totalorder %v185_v32, 31  ;;  %v6401_v42 = vpack.c.bf16 %v334_v37, %v327_v36  ;;  %v5234_v24 = vld [vmem:[%s7246_s14 + $0x20] sm:$0xff]  ;;  %v5235_v27 = vld [vmem:[%s7246_s14 + $0x28] sm:$0xff]  ;;  %p7040_p5 = pnand %p7039_p3, %p7033_p2 }
  0x53   : > { %vm173_vm7 = vcmp.eq.s32.totalorder %v7258_v3, %v166_v28  ;;  %vm174_vm8 = vcmp.eq.s32.totalorder %v7258_v3, %v168_v31  ;;  %v7311_v43 = vsel %vm186_vm9, %v185_v32, 31  ;;  %v170_v45 = vsel %vm169_vm10, %v162_v33, 31  ;;  %v5236_v31 = vld [vmem:[%s7246_s14 + $0x30] sm:$0xff]  ;;  %v5237_v32 = vld [vmem:[%s7246_s14 + $0x38] sm:$0xff] }
  0x54   : > { %v7299_v35 = vsel %vm173_vm7, 1.0, %v7104_v34  ;;  %v7302_v38 = vsel %vm174_vm8, 1.0, %v7104_v34  ;;  %vm188_vm11 = vcmp.eq.s32.totalorder %v7253_v1, %v7311_v43  ;;  %vm189_vm12 = vcmp.eq.s32.totalorder %v7256_v2, %v7311_v43  ;;  %6402 = vmatprep.subr.bf16.mxu0 %v6401_v42 }
  0x55   : > { %v202_v39 = vsel %vm200_vm0, %v7299_v35, 0  ;;  %v205_v40 = vsel %vm200_vm0, %v7302_v38, 0  ;;  %vm190_vm13 = vcmp.eq.s32.totalorder %v7266_v7, %v7311_v43  ;;  %vm7333_vm14 = vmpackc.low %vm189_vm12, %vm188_vm11  ;;  %vm175_vm15 = vcmp.eq.s32.totalorder %v7258_v3, %v170_v45 }
  0x56   : > { %v7309_v41 = vsub.f32 %v202_v39, %v202_v39  ;;  %v7313_v44 = vsub.f32 %v205_v40, %v205_v40  ;;  %v7342_v50 = vsel %vm175_vm15, 1.0, %v7104_v34  ;;  %vm191_vm1 = vcmp.eq.s32.totalorder %v7269_v8, %v7311_v43 }
  0x57   : > { %v208_v55 = vsel %vm200_vm0, %v7342_v50, 0  ;;  %vm163_vm2 = vcmp.gt.s32.totalorder %v156_v52, 0  ;;  %v347_v0 = vsub.f32 %v345_v51, %v346_v58  ;;  %v341_v4 = vand.u32 4294901760, %v340_v61  ;;  %vm7573_vm5 = vmpackc.low %vm191_vm1, %vm190_vm13 }
  0x58   : > { %v7322_v46 = vand.u32 4294901760, %v7309_v41  ;;  %v7325_v47 = vand.u32 4294901760, %v7313_v44  ;;  %v7354_v57 = vsub.f32 %v208_v55, %v208_v55  ;;  %v164_v62 = vsel %vm163_vm2, %v156_v52, 0 }
  0x59   : > { %vm171_vm3 = vcmp.lt.s32.totalorder %v164_v62, 31  ;;  %v348_v9 = vand.u32 4294901760, %v347_v0  ;;  %v6413_v21 = vpack.c.bf16 %v345_v51, %v7339_v49  ;;  %v6425_v23 = vpack.c.bf16 %v332_v26, %v325_v25 }
  0x5a   : > { %v285_v53 = vsub.f32 %v7309_v41, %v7322_v46  ;;  %v295_v54 = vsub.f32 %v7313_v44, %v7325_v47  ;;  %v7362_v63 = vand.u32 4294901760, %v7354_v57  ;;  %v172_v5 = vsel %vm171_vm3, %v164_v62, 31 }
  0x5b   : > { %vm176_vm4 = vcmp.eq.s32.totalorder %v7258_v3, %v172_v5  ;;  %v6405_v12 = vpack.c.bf16 %v348_v9, %v341_v4  ;;  %v6429_v28 = vpack.c.bf16 %v346_v58, %v339_v56  ;;  %v1439_v29 = vand.u32 4294901760, %v5234_v24  ;;  %v5266_v5 = vld [vmem:[%s7246_s14 + $0x40] sm:$0xff] }
  0x5c   : > { %v7356_v59 = vand.u32 4294901760, %v285_v53  ;;  %v7358_v60 = vand.u32 4294901760, %v295_v54  ;;  %v305_v6 = vsub.f32 %v7354_v57, %v7362_v63  ;;  %v7370_v10 = vsel %vm176_vm4, 1.0, %v7104_v34 }
  0x5d   : > { %v211_v13 = vsel %vm200_vm0, %v7370_v10, 0  ;;  %v1442_v30 = vand.u32 4294901760, %v5235_v27  ;;  %v1445_v19 = vand.u32 4294901760, %v5236_v31  ;;  %v1448_v20 = vand.u32 4294901760, %v5237_v32 }
  0x5e   : > { %5729 = vmatprep.mubr.f32.mxu0 %v7356_v59  ;;  %v7372_v11 = vand.u32 4294901760, %v305_v6  ;;  %v7378_v15 = vsub.f32 %v211_v13, %v211_v13  ;;  %v7417_v25 = vsub.f32 %v5234_v24, %v1439_v29  ;;  %v5267_v6 = vld [vmem:[%s7246_s14 + $0x48] sm:$0xff] }
  0x5f   : > { %5730 = vmatmul.mubr.f32.vlgmr.msra.gmra.mrb[0].mxu0 %v7358_v60  ;;  %v1556_v26 = vsub.f32 %v5235_v27, %v1442_v30  ;;  %v1563_v37 = vsub.f32 %v5236_v31, %v1445_v19  ;;  %v1570_v39 = vsub.f32 %v5237_v32, %v1448_v20  ;;  %v7429_v40 = vpack.c.bf16 %v1442_v30, %v1439_v29 }
  0x60   : > { %6404 = vmatpush3.bf16.msra.mxu0 %v6401_v42  ;;  %5732 = vmatprep.mubr.f32.mxu0 %v7372_v11  ;;  %v7382_v3 = vand.u32 4294901760, %v7378_v15  ;;  %v1550_v33 = vand.u32 4294901760, %v7417_v25  ;;  %v2668_v13 = vand.u32 4294901760, %v5267_v6 }
  0x61   : > { %6406 = vmatprep.subr.bf16.mxu0 %v6405_v12  ;;  %v1557_v36 = vand.u32 4294901760, %v1556_v26  ;;  %v1564_v49 = vand.u32 4294901760, %v1563_v37  ;;  %v1571_v51 = vand.u32 4294901760, %v1570_v39  ;;  %v6505_v62 = vpack.c.bf16 %v1556_v26, %v7417_v25 }
  0x62   : > { %v315_v16 = vsub.f32 %v7378_v15, %v7382_v3  ;;  %v1551_v42 = vsub.f32 %v7417_v25, %v1550_v33  ;;  %v6509_v0 = vpack.c.bf16 %v1570_v39, %v1563_v37  ;;  %v2782_v27 = vsub.f32 %v5267_v6, %v2668_v13 }
  0x63   : > { %v1558_v45 = vsub.f32 %v1556_v26, %v1557_v36  ;;  %v1565_v54 = vsub.f32 %v1563_v37, %v1564_v49  ;;  %v1572_v55 = vsub.f32 %v1570_v39, %v1571_v51  ;;  %v6521_v4 = vpack.c.bf16 %v1557_v36, %v1550_v33 }
  0x64   : > { %6408 = vmatpush3.bf16.msra.mxu0 %v6405_v12  ;;  %v7386_v17 = vand.u32 4294901760, %v315_v16  ;;  %v1552_v52 = vand.u32 4294901760, %v1551_v42  ;;  %v6525_v9 = vpack.c.bf16 %v1571_v51, %v1564_v49  ;;  %v2665_v12 = vand.u32 4294901760, %v5266_v5  ;;  %v5269_v16 = vld [vmem:[%s7246_s14 + $0x58] sm:$0xff] }
  0x65   : > { %6410 = vmatprep.subr.bf16.mxu0 %v6409_v14  ;;  %v1559_v53 = vand.u32 4294901760, %v1558_v45  ;;  %v1566_v56 = vand.u32 4294901760, %v1565_v54  ;;  %v1573_v58 = vand.u32 4294901760, %v1572_v55  ;;  %v2783_v29 = vand.u32 4294901760, %v2782_v27  ;;  %v5298_v54 = vld [vmem:[%s7246_s14 + $0x60] sm:$0xff]  ;;  %v5299_v55 = vld [vmem:[%s7246_s14 + $0x68] sm:$0xff] }
  0x66   : > { %5733 = vmatmul.mubr.f32.gmra.mrb[2].mxu0 %v7386_v17  ;;  %v7478_v24 = vsub.f32 %v5266_v5, %v2665_v12  ;;  %v7490_v32 = vpack.c.bf16 %v2668_v13, %v2665_v12 }
  0x67   : > { %5743 = vmatprep.mubr.msk.f32.mxu0 %vm200_vm0, %v7299_v35  ;;  %v6501_v61 = vpack.c.bf16 %v1573_v58, %v1566_v56  ;;  %v3891_v56 = vand.u32 4294901760, %v5298_v54  ;;  %v3894_v58 = vand.u32 4294901760, %v5299_v55 }
  0x69   : > { %v7539_v5 = vsub.f32 %v5298_v54, %v3891_v56  ;;  %v7541_v6 = vsub.f32 %v5299_v55, %v3894_v58  ;;  %v7580_v2 = vpack.c.bf16 %v3894_v58, %v3891_v56 }
  0x6a   : > { %5744 = vmatmul.mubr.msk.f32.vlgmr.msra.gmra.mrb[0].mxu0 %vm200_vm0, %v7302_v38 }
  0x6b   : > { %6412 = vmatpush3.bf16.msra.mxu0 %v6409_v14  ;;  %5746 = vmatprep.mubr.msk.f32.mxu0 %vm200_vm0, %v7342_v50  ;;  %v5268_v14 = vld [vmem:[%s7246_s14 + $0x50] sm:$0xff]  ;;  %v4002_v13 = vand.u32 4294901760, %v7539_v5  ;;  %v6697_v54 = vpack.c.bf16 %v7541_v6, %v7539_v5 }
  0x6c   : > { %6414 = vmatprep.subr.bf16.mxu0 %v6413_v21 }
  0x6e   : > { %5747 = vmatmul.mubr.msk.f32.gmra.mrb[2].mxu0 %vm200_vm0, %v7370_v10 }
  0x6f   : > { %6416 = vmatpush3.bf16.msra.mxu0 %v6413_v21  ;;  %5757 = vmatprep.mubr.f32.mxu0 %v7309_v41  ;;  %v2671_v21 = vand.u32 4294901760, %v5268_v14 }
  0x70   : > { %6418 = vmatprep.subr.bf16.mxu0 %v7275_v18 }
  0x71   : > { %v2789_v30 = vsub.f32 %v5268_v14, %v2671_v21  ;;  %v4009_v14 = vand.u32 4294901760, %v7541_v6 }
  0x72   : > { %5758 = vmatmul.mubr.f32.vlgmr.msra.gmra.mrb[0].mxu0 %v7313_v44 }
  0x73   : > { %6420 = vmatpush3.bf16.msra.mxu0 %v7275_v18  ;;  %5760 = vmatprep.mubr.f32.mxu0 %v7354_v57  ;;  %v2790_v25 = vand.u32 4294901760, %v2789_v30 }
  0x74   : > { %6422 = vmatprep.subr.bf16.mxu0 %v7282_v22 }
  0x75   : > { %v2791_v39 = vsub.f32 %v2789_v30, %v2790_v25 }
  0x76   : > { %5761 = vmatmul.mubr.f32.gmra.mrb[2].mxu0 %v7378_v15 }
  0x77   : > { %6424 = vmatpush3.bf16.msra.mxu0 %v7282_v22  ;;  %5771 = vmatprep.mubr.f32.mxu0 %v7322_v46  ;;  %v2792_v45 = vand.u32 4294901760, %v2791_v39 }
  0x78   : > { %6426 = vmatprep.subr.bf16.mxu0 %v6425_v23 }
  0x7a   : > { %5772 = vmatmul.mubr.f32.vlgmr.msra.gmra.mrb[0].mxu0 %v7325_v47 }
  0x7b   : > { %6428 = vmatpush3.bf16.msra.mxu0 %v6425_v23  ;;  %5774 = vmatprep.mubr.f32.mxu0 %v7362_v63  ;;  %v2674_v23 = vand.u32 4294901760, %v5269_v16 }
  0x7c   : > { %6430 = vmatprep.subr.bf16.mxu0 %v6429_v28 }
  0x7d   : > { %v2796_v31 = vsub.f32 %v5269_v16, %v2674_v23  ;;  %v7499_v33 = vpack.c.bf16 %v2674_v23, %v2671_v21  ;;  %v192_v16 = vsel %vm188_vm11, 1.0, %v7104_v34  ;;  %v193_v21 = vsel %vm189_vm12, 1.0, %v7104_v34 }
  0x7e   : > { %5775 = vmatmul.mubr.f32.gmra.mrb[2].mxu0 %v7382_v3  ;;  %v7561_v23 = vsub.f32 %v192_v16, %v192_v16 }
  0x7f   : > { %6432 = vmatpush3.bf16.msra.mxu0 %v6429_v28  ;;  %5785 = vmatprep.mubr.msk.f32.mxu0 %vm200_vm0, %v7299_v35  ;;  %v2776_v28 = vand.u32 4294901760, %v7478_v24  ;;  %v2797_v26 = vand.u32 4294901760, %v2796_v31 }
  0x80   : > { %6434 = vmatprep.subr.bf16.mxu0 %v7275_v18 }
  0x82   : > { %5786 = vmatmul.mubr.msk.f32.vlgmr.msra.gmra.mrb[0].mxu0 %vm200_vm0, %v7302_v38 }
  0x83   : > { %6436 = vmatpush3.bf16.msra.mxu0 %v7275_v18  ;;  %5788 = vmatprep.mubr.msk.f32.mxu0 %vm200_vm0, %v7342_v50  ;;  %v7438_v18 = vpack.c.bf16 %v1448_v20, %v1445_v19  ;;  %v2777_v19 = vsub.f32 %v7478_v24, %v2776_v28  ;;  %v2784_v20 = vsub.f32 %v2782_v27, %v2783_v29 }
  0x84   : > { %6438 = vmatprep.subr.bf16.mxu0 %v7282_v22 }
  0x85   : > { %v2778_v36 = vand.u32 4294901760, %v2777_v19  ;;  %v2785_v37 = vand.u32 4294901760, %v2784_v20  ;;  %v7105_v19 = vmov 1.0|1.0  }
  0x86   : > { %5789 = vmatmul.mubr.msk.f32.gmra.mrb[2].mxu0 %vm200_vm0, %v7370_v10  ;;  %6442 = vmatprep.subr.msk.bf16.mxu1 %vm7333_vm14, %v7105_v19 }
  0x87   : > { %6440 = vmatpush3.bf16.msra.mxu0 %v7282_v22  ;;  %5799 = vmatprep.mubr.msk.f32.mxu0 %vm200_vm0, %v7299_v35  ;;  %v6497_v22 = vpack.c.bf16 %v1559_v53, %v1552_v52  ;;  %v6593_v42 = vpack.c.bf16 %v2785_v37, %v2778_v36  ;;  %v6605_v52 = vpack.c.bf16 %v2796_v31, %v2789_v30 }
  0x88   : > { %6490 = vmatprep.subr.bf16.mxu0 %v7429_v40  ;;  %v6617_v53 = vpack.c.bf16 %v2783_v29, %v2776_v28  ;;  %v4003_v29 = vsub.f32 %v7539_v5, %v4002_v13  ;;  %v4010_v30 = vsub.f32 %v7541_v6, %v4009_v14  ;;  %6444 = vmatpush3.bf16.msk.msra.mxu1 %vm7333_vm14, %v7105_v19 }
  0x89   : > { %6446 = vmatprep.subr.msk.bf16.mxu1 %vm7573_vm5, %v7105_v19 }
  0x8a   : > { %5800 = vmatmul.mubr.msk.f32.vlgmr.msra.gmra.mrb[0].mxu0 %vm200_vm0, %v7302_v38  ;;  %v4004_v39 = vand.u32 4294901760, %v4003_v29 }
  0x8b   : > { %6492 = vmatpush3.bf16.msra.mxu0 %v7429_v40  ;;  %5802 = vmatprep.mubr.msk.f32.mxu0 %vm200_vm0, %v7342_v50 }
  0x8c   : > { %6494 = vmatprep.subr.bf16.mxu0 %v7438_v18  ;;  %6448 = vmatpush3.bf16.msk.msra.mxu1 %vm7573_vm5, %v7105_v19 }
  0x8e   : > { %5803 = vmatmul.mubr.msk.f32.gmra.mrb[2].mxu0 %vm200_vm0, %v7370_v10 }
  0x8f   : > { %6496 = vmatpush3.bf16.msra.mxu0 %v7438_v18  ;;  %5897 = vmatprep.mubr.f32.mxu0 %v7356_v59 }
  0x90   : > { %6498 = vmatprep.subr.bf16.mxu0 %v6497_v22 }
  0x92   : > { %5898 = vmatmul.mubr.f32.vlgmr.msra.gmra.mrb[4].mxu0 %v7358_v60 }
  0x93   : > { %6500 = vmatpush3.bf16.msra.mxu0 %v6497_v22  ;;  %5900 = vmatprep.mubr.f32.mxu0 %v7372_v11  ;;  %v6621_v22 = vpack.c.bf16 %v2797_v26, %v2790_v25 }
  0x94   : > { %6502 = vmatprep.subr.bf16.mxu0 %v6501_v61 }
  0x96   : > { %5901 = vmatmul.mubr.f32.gmra.mrb[6].mxu0 %v7386_v17 }
  0x97   : > { %6504 = vmatpush3.bf16.msra.mxu0 %v6501_v61  ;;  %5911 = vmatprep.mubr.msk.f32.mxu0 %vm200_vm0, %v7299_v35  ;;  %v5300_v61 = vld [vmem:[%s7246_s14 + $0x70] sm:$0xff] }
  0x98   : > { %6506 = vmatprep.subr.bf16.mxu0 %v6505_v62 }
  0x9a   : > { %5912 = vmatmul.mubr.msk.f32.vlgmr.msra.gmra.mrb[4].mxu0 %vm200_vm0, %v7302_v38 }
  0x9b   : > { %6508 = vmatpush3.bf16.msra.mxu0 %v6505_v62  ;;  %5914 = vmatprep.mubr.msk.f32.mxu0 %vm200_vm0, %v7342_v50  ;;  %v5301_v62 = vld [vmem:[%s7246_s14 + $0x78] sm:$0xff] }
  0x9c   : > { %6510 = vmatprep.subr.bf16.mxu0 %v6509_v0 }
  0x9e   : > { %5915 = vmatmul.mubr.msk.f32.gmra.mrb[6].mxu0 %vm200_vm0, %v7370_v10 }
  0x9f   : > { %6512 = vmatpush3.bf16.msra.mxu0 %v6509_v0  ;;  %5925 = vmatprep.mubr.f32.mxu0 %v7309_v41  ;;  %v3897_v0 = vand.u32 4294901760, %v5300_v61 }
  0xa0   : > { %6514 = vmatprep.subr.bf16.mxu0 %v7429_v40 }
  0xa2   : > { %5926 = vmatmul.mubr.f32.vlgmr.msra.gmra.mrb[4].mxu0 %v7313_v44 }
  0xa3   : > { %6516 = vmatpush3.bf16.msra.mxu0 %v7429_v40  ;;  %5928 = vmatprep.mubr.f32.mxu0 %v7354_v57 }
  0xa4   : > { %6518 = vmatprep.subr.bf16.mxu0 %v7438_v18 }
  0xa6   : > { %5929 = vmatmul.mubr.f32.gmra.mrb[6].mxu0 %v7378_v15 }
  0xa7   : > { %6520 = vmatpush3.bf16.msra.mxu0 %v7438_v18  ;;  %5939 = vmatprep.mubr.f32.mxu0 %v7322_v46 }
  0xa8   : > { %6522 = vmatprep.subr.bf16.mxu0 %v6521_v4 }
  0xaa   : > { %5940 = vmatmul.mubr.f32.vlgmr.msra.gmra.mrb[4].mxu0 %v7325_v47 }
  0xab   : > { %6524 = vmatpush3.bf16.msra.mxu0 %v6521_v4  ;;  %5942 = vmatprep.mubr.f32.mxu0 %v7362_v63  ;;  %v3900_v4 = vand.u32 4294901760, %v5301_v62 }
  0xac   : > { %6526 = vmatprep.subr.bf16.mxu0 %v6525_v9 }
  0xad   : > { %v7548_v12 = vsub.f32 %v5301_v62, %v3900_v4 }
  0xae   : > { %5943 = vmatmul.mubr.f32.gmra.mrb[6].mxu0 %v7382_v3 }
  0xaf   : > { %6528 = vmatpush3.bf16.msra.mxu0 %v6525_v9  ;;  %5953 = vmatprep.mubr.msk.f32.mxu0 %vm200_vm0, %v7299_v35  ;;  %v7546_v9 = vsub.f32 %v5300_v61, %v3897_v0 }
  0xb0   : > { %6530 = vmatprep.subr.bf16.mxu0 %v7429_v40 }
  0xb2   : > { %5954 = vmatmul.mubr.msk.f32.vlgmr.msra.gmra.mrb[4].mxu0 %vm200_vm0, %v7302_v38 }
  0xb3   : > { %6532 = vmatpush3.bf16.msra.mxu0 %v7429_v40  ;;  %5956 = vmatprep.mubr.msk.f32.mxu0 %vm200_vm0, %v7342_v50  ;;  %v2798_v40 = vsub.f32 %v2796_v31, %v2797_v26  ;;  %v4016_v31 = vand.u32 4294901760, %v7546_v9  ;;  %v7609_v26 = vpack.c.bf16 %v3900_v4, %v3897_v0 }
  0xb4   : > { %6534 = vmatprep.subr.bf16.mxu0 %v7438_v18 }
  0xb5   : > { %v2799_v49 = vand.u32 4294901760, %v2798_v40  ;;  %v4011_v40 = vand.u32 4294901760, %v4010_v30 }
  0xb6   : > { %5957 = vmatmul.mubr.msk.f32.gmra.mrb[6].mxu0 %vm200_vm0, %v7370_v10 }
  0xb7   : > { %6536 = vmatpush3.bf16.msra.mxu0 %v7438_v18  ;;  %5967 = vmatprep.mubr.msk.f32.mxu0 %vm200_vm0, %v7299_v35  ;;  %v6597_v51 = vpack.c.bf16 %v2799_v49, %v2792_v45  ;;  %v6601_v18 = vpack.c.bf16 %v2782_v27, %v7478_v24  ;;  %v7563_v24 = vsub.f32 %v193_v21, %v193_v21  ;;  %v946_v27 = vand.u32 4294901760, %v7561_v23 }
  0xb8   : > { %6586 = vmatprep.subr.bf16.mxu0 %v7490_v32  ;;  %v6689_v49 = vpack.c.bf16 %v4011_v40, %v4004_v39 }
  0xb9   : > { %v952_v28 = vand.u32 4294901760, %v7563_v24  ;;  %v947_v20 = vsub.f32 %v7561_v23, %v946_v27 }
  0xba   : > { %5968 = vmatmul.mubr.msk.f32.vlgmr.msra.gmra.mrb[4].mxu0 %vm200_vm0, %v7302_v38 }
  0xbb   : > { %6588 = vmatpush3.bf16.msra.mxu0 %v7490_v32  ;;  %5970 = vmatprep.mubr.msk.f32.mxu0 %vm200_vm0, %v7342_v50  ;;  %v953_v25 = vsub.f32 %v7563_v24, %v952_v28  ;;  %v948_v36 = vand.u32 4294901760, %v947_v20 }
  0xbc   : > { %6590 = vmatprep.subr.bf16.mxu0 %v7499_v33 }
  0xbd   : > { %v954_v37 = vand.u32 4294901760, %v953_v25 }
  0xbe   : > { %5971 = vmatmul.mubr.msk.f32.gmra.mrb[6].mxu0 %vm200_vm0, %v7370_v10 }
  0xbf   : > { %6592 = vmatpush3.bf16.msra.mxu0 %v7499_v33  ;;  %6065 = vmatprep.mubr.f32.mxu0 %v7356_v59 }
  0xc0   : > { %6594 = vmatprep.subr.bf16.mxu0 %v6593_v42 }
  0xc2   : > { %6066 = vmatmul.mubr.f32.vlgmr.msra.gmra.mrb[8].mxu0 %v7358_v60 }
  0xc3   : > { %6596 = vmatpush3.bf16.msra.mxu0 %v6593_v42  ;;  %6068 = vmatprep.mubr.f32.mxu0 %v7372_v11  ;;  %v4017_v42 = vsub.f32 %v7546_v9, %v4016_v31 }
  0xc4   : > { %6598 = vmatprep.subr.bf16.mxu0 %v6597_v51 }
  0xc6   : > { %6069 = vmatmul.mubr.f32.gmra.mrb[10].mxu0 %v7386_v17 }
  0xc7   : > { %6600 = vmatpush3.bf16.msra.mxu0 %v6597_v51  ;;  %6079 = vmatprep.mubr.msk.f32.mxu0 %vm200_vm0, %v7299_v35  ;;  %v4018_v51 = vand.u32 4294901760, %v4017_v42 }
  0xc8   : > { %6602 = vmatprep.subr.bf16.mxu0 %v6601_v18 }
  0xca   : > { %6080 = vmatmul.mubr.msk.f32.vlgmr.msra.gmra.mrb[8].mxu0 %vm200_vm0, %v7302_v38 }
  0xcb   : > { %6604 = vmatpush3.bf16.msra.mxu0 %v6601_v18  ;;  %6082 = vmatprep.mubr.msk.f32.mxu0 %vm200_vm0, %v7342_v50 }
  0xcc   : > { %6606 = vmatprep.subr.bf16.mxu0 %v6605_v52 }
  0xce   : > { %6083 = vmatmul.mubr.msk.f32.gmra.mrb[10].mxu0 %vm200_vm0, %v7370_v10 }
  0xcf   : > { %6608 = vmatpush3.bf16.msra.mxu0 %v6605_v52  ;;  %6093 = vmatprep.mubr.f32.mxu0 %v7309_v41 }
  0xd0   : > { %6610 = vmatprep.subr.bf16.mxu0 %v7490_v32 }
  0xd2   : > { %6094 = vmatmul.mubr.f32.vlgmr.msra.gmra.mrb[8].mxu0 %v7313_v44 }
  0xd3   : > { %6612 = vmatpush3.bf16.msra.mxu0 %v7490_v32  ;;  %6096 = vmatprep.mubr.f32.mxu0 %v7354_v57 }
  0xd4   : > { %6614 = vmatprep.subr.bf16.mxu0 %v7499_v33 }
  0xd6   : > { %6097 = vmatmul.mubr.f32.gmra.mrb[10].mxu0 %v7378_v15 }
  0xd7   : > { %6616 = vmatpush3.bf16.msra.mxu0 %v7499_v33  ;;  %6107 = vmatprep.mubr.f32.mxu0 %v7322_v46 }
  0xd8   : > { %6618 = vmatprep.subr.bf16.mxu0 %v6617_v53 }
  0xda   : > { %6108 = vmatmul.mubr.f32.vlgmr.msra.gmra.mrb[8].mxu0 %v7325_v47 }
  0xdb   : > { %6620 = vmatpush3.bf16.msra.mxu0 %v6617_v53  ;;  %6110 = vmatprep.mubr.f32.mxu0 %v7362_v63  ;;  %v7634_v53 = vpack.c.bf16 %v7563_v24, %v7561_v23 }
  0xdc   : > { %6622 = vmatprep.subr.bf16.mxu0 %v6621_v22 }
  0xde   : > { %6111 = vmatmul.mubr.f32.gmra.mrb[10].mxu0 %v7382_v3 }
  0xdf   : > { %6624 = vmatpush3.bf16.msra.mxu0 %v6621_v22  ;;  %6121 = vmatprep.mubr.msk.f32.mxu0 %vm200_vm0, %v7299_v35 }
  0xe0   : > { %6626 = vmatprep.subr.bf16.mxu0 %v7490_v32 }
  0xe2   : > { %6122 = vmatmul.mubr.msk.f32.vlgmr.msra.gmra.mrb[8].mxu0 %vm200_vm0, %v7302_v38 }
  0xe3   : > { %6628 = vmatpush3.bf16.msra.mxu0 %v7490_v32  ;;  %6124 = vmatprep.mubr.msk.f32.mxu0 %vm200_vm0, %v7342_v50  ;;  %v4023_v32 = vand.u32 4294901760, %v7548_v12 }
  0xe4   : > { %6630 = vmatprep.subr.bf16.mxu0 %v7499_v33 }
  0xe5   : > { %v4024_v45 = vsub.f32 %v7548_v12, %v4023_v32 }
  0xe6   : > { %6125 = vmatmul.mubr.msk.f32.gmra.mrb[10].mxu0 %vm200_vm0, %v7370_v10 }
  0xe7   : > { %6632 = vmatpush3.bf16.msra.mxu0 %v7499_v33  ;;  %6135 = vmatprep.mubr.msk.f32.mxu0 %vm200_vm0, %v7299_v35  ;;  %v7619_v33 = vpack.c.bf16 %v954_v37, %v948_v36  ;;  %v4025_v18 = vand.u32 4294901760, %v4024_v45 }
  0xe8   : > { %6682 = vmatprep.subr.bf16.mxu0 %v7580_v2 }
  0xe9   : > { %6450 = vmatprep.subr.bf16.mxu1 %v7619_v33  ;;  %v6693_v52 = vpack.c.bf16 %v4025_v18, %v4018_v51 }
  0xea   : > { %6136 = vmatmul.mubr.msk.f32.vlgmr.msra.gmra.mrb[8].mxu0 %vm200_vm0, %v7302_v38 }
  0xeb   : > { %6684 = vmatpush3.bf16.msra.mxu0 %v7580_v2  ;;  %6138 = vmatprep.mubr.msk.f32.mxu0 %vm200_vm0, %v7342_v50 }
  0xec   : > { %6686 = vmatprep.subr.bf16.mxu0 %v7609_v26 }
  0xee   : > { %6139 = vmatmul.mubr.msk.f32.gmra.mrb[10].mxu0 %vm200_vm0, %v7370_v10 }
  0xef   : > { %6688 = vmatpush3.bf16.msra.mxu0 %v7609_v26  ;;  %6233 = vmatprep.mubr.f32.mxu0 %v7356_v59  ;;  %v6701_v59 = vpack.c.bf16 %v7548_v12, %v7546_v9 }
  0xf0   : > { %6690 = vmatprep.subr.bf16.mxu0 %v6689_v49 }
  0xf2   : > { %6234 = vmatmul.mubr.f32.vlgmr.msra.gmra.mrb[12].mxu0 %v7358_v60  ;;  %v7653_v60 = vpack.c.bf16 %v952_v28, %v946_v27 }
  0xf3   : > { %6692 = vmatpush3.bf16.msra.mxu0 %v6689_v49  ;;  %6236 = vmatprep.mubr.f32.mxu0 %v7372_v11  ;;  %v6713_v11 = vpack.c.bf16 %v4009_v14, %v4002_v13 }
  0xf4   : > { %6694 = vmatprep.subr.bf16.mxu0 %v6693_v52 }
  0xf6   : > { %6237 = vmatmul.mubr.f32.gmra.mrb[14].mxu0 %v7386_v17 }
  0xf7   : > { %6696 = vmatpush3.bf16.msra.mxu0 %v6693_v52  ;;  %6247 = vmatprep.mubr.msk.f32.mxu0 %vm200_vm0, %v7299_v35 }
  0xf8   : > { %6698 = vmatprep.subr.bf16.mxu0 %v6697_v54 }
  0xfa   : > { %6248 = vmatmul.mubr.msk.f32.vlgmr.msra.gmra.mrb[12].mxu0 %vm200_vm0, %v7302_v38 }
  0xfb   : > { %6700 = vmatpush3.bf16.msra.mxu0 %v6697_v54  ;;  %6250 = vmatprep.mubr.msk.f32.mxu0 %vm200_vm0, %v7342_v50 }
  0xfc   : > { %6702 = vmatprep.subr.bf16.mxu0 %v6701_v59 }
  0xfe   : > { %6251 = vmatmul.mubr.msk.f32.gmra.mrb[14].mxu0 %vm200_vm0, %v7370_v10 }
  0xff   : > { %6704 = vmatpush3.bf16.msra.mxu0 %v6701_v59  ;;  %6261 = vmatprep.mubr.f32.mxu0 %v7309_v41  ;;  %v6717_v41 = vpack.c.bf16 %v4023_v32, %v4016_v31 }
 0x100   : > { %6706 = vmatprep.subr.bf16.mxu0 %v7580_v2 }
 0x102   : > { %6262 = vmatmul.mubr.f32.vlgmr.msra.gmra.mrb[12].mxu0 %v7313_v44  ;;  %v194_v44 = vsel %vm190_vm13, 1.0, %v7104_v34 }
 0x103   : > { %6708 = vmatpush3.bf16.msra.mxu0 %v7580_v2  ;;  %6264 = vmatprep.mubr.f32.mxu0 %v7354_v57 }
 0x104   : > { %6710 = vmatprep.subr.bf16.mxu0 %v7609_v26 }
 0x106   : > { %6265 = vmatmul.mubr.f32.gmra.mrb[14].mxu0 %v7378_v15 }
 0x107   : > { %6712 = vmatpush3.bf16.msra.mxu0 %v7609_v26  ;;  %6275 = vmatprep.mubr.f32.mxu0 %v7322_v46  ;;  %v195_v46 = vsel %vm191_vm1, 1.0, %v7104_v34 }
 0x108   : > { %6714 = vmatprep.subr.bf16.mxu0 %v6713_v11 }
 0x10a   : > { %6276 = vmatmul.mubr.f32.vlgmr.msra.gmra.mrb[12].mxu0 %v7325_v47  ;;  %v7701_v47 = vsub.f32 %v195_v46, %v195_v46 }
 0x10b   : > { %6716 = vmatpush3.bf16.msra.mxu0 %v6713_v11  ;;  %6278 = vmatprep.mubr.f32.mxu0 %v7362_v63 }
 0x10c   : > { %6718 = vmatprep.subr.bf16.mxu0 %v6717_v41  ;;  %v964_v57 = vand.u32 4294901760, %v7701_v47 }
 0x10e   : > { %6279 = vmatmul.mubr.f32.gmra.mrb[14].mxu0 %v7382_v3  ;;  %v965_v17 = vsub.f32 %v7701_v47, %v964_v57 }
 0x10f   : > { %6720 = vmatpush3.bf16.msra.mxu0 %v6717_v41  ;;  %6289 = vmatprep.mubr.msk.f32.mxu0 %vm200_vm0, %v7299_v35 }
 0x110   : > { %6722 = vmatprep.subr.bf16.mxu0 %v7580_v2  ;;  %v966_v12 = vand.u32 4294901760, %v965_v17 }
 0x112   : > { %6290 = vmatmul.mubr.msk.f32.vlgmr.msra.gmra.mrb[12].mxu0 %vm200_vm0, %v7302_v38 }
 0x113   : > { %6724 = vmatpush3.bf16.msra.mxu0 %v7580_v2  ;;  %6292 = vmatprep.mubr.msk.f32.mxu0 %vm200_vm0, %v7342_v50 }
 0x114   : > { %6726 = vmatprep.subr.bf16.mxu0 %v7609_v26 }
 0x116   : > { %6293 = vmatmul.mubr.msk.f32.gmra.mrb[14].mxu0 %vm200_vm0, %v7370_v10 }
 0x117   : > { %6728 = vmatpush3.bf16.msra.mxu0 %v7609_v26  ;;  %6303 = vmatprep.mubr.msk.f32.mxu0 %vm200_vm0, %v7299_v35  ;;  %v7699_v35 = vsub.f32 %v194_v44, %v194_v44 }
 0x119   : > { %v7732_v31 = vpack.c.bf16 %v7701_v47, %v7699_v35 }
 0x11a   : > { %6304 = vmatmul.mubr.msk.f32.vlgmr.msra.gmra.mrb[12].mxu0 %vm200_vm0, %v7302_v38 }
 0x11b   : > { %6306 = vmatprep.mubr.msk.f32.mxu0 %vm200_vm0, %v7342_v50  ;;  %v958_v50 = vand.u32 4294901760, %v7699_v35 }
 0x11d   : > { %v959_v43 = vsub.f32 %v7699_v35, %v958_v50  ;;  %v7753_v32 = vpack.c.bf16 %v964_v57, %v958_v50 }
 0x11e   : > { %6307 = vmatmul.mubr.msk.f32.gmra.mrb[14].mxu0 %vm200_vm0, %v7370_v10 }
 0x11f   : > { %v960_v9 = vand.u32 4294901760, %v959_v43 }
 0x121   : > { %v7723_v2 = vpack.c.bf16 %v966_v12, %v960_v9 }
 0x15d   : > { %v5801_v38 = vpop.f32.mrb[0].mxu0 }
 0x15e   : > { %v831_v63 = vsel %vm200_vm0, %v5801_v38, 0  ;;  %v805_v10 = vpop.f32.mrb[1].mxu0 }
 0x15f   : > { %v7706_v15 = vand.u32 4294901760, %v831_v63  ;;  %v828_v7 = vsel %vm200_vm0, %v805_v10, 0 }
 0x160   : > { %v7709_v3 = vand.u32 4294901760, %v828_v7 }
 0x161   : > { %v915_v8 = vsub.f32 %v831_v63, %v7706_v15  ;;  %v5804_v34 = vpop.f32.mrb[2].mxu0 }
 0x162   : > { %v905_v55 = vsub.f32 %v828_v7, %v7709_v3  ;;  %v837_v22 = vsel %vm200_vm0, %v5804_v34, 0  ;;  %v817_v56 = vpop.f32.mrb[3].mxu0 }
 0x163   : > { %v916_v58 = vand.u32 4294901760, %v915_v8  ;;  %v7716_v61 = vand.u32 4294901760, %v837_v22  ;;  %v834_v62 = vsel %vm200_vm0, %v817_v56, 0 }
 0x164   : > { %v7719_v0 = vand.u32 4294901760, %v834_v62  ;;  %v906_v4 = vand.u32 4294901760, %v905_v55 }
 0x165   : > { %v935_v5 = vsub.f32 %v837_v22, %v7716_v61  ;;  %v917_v6 = vsub.f32 %v915_v8, %v916_v58 }
 0x166   : > { %v925_v13 = vsub.f32 %v834_v62, %v7719_v0  ;;  %v907_v14 = vsub.f32 %v905_v55, %v906_v4 }
 0x167   : > { %v936_v16 = vand.u32 4294901760, %v935_v5  ;;  %v918_v24 = vand.u32 4294901760, %v917_v6 }
 0x168   : > { %v926_v21 = vand.u32 4294901760, %v925_v13  ;;  %v908_v23 = vand.u32 4294901760, %v907_v14 }
 0x169   : > { %v937_v27 = vsub.f32 %v935_v5, %v936_v16 }
 0x16a   : > { %5813 = vmatprep.mubr.f32.mxu1 %v908_v23  ;;  %v927_v28 = vsub.f32 %v925_v13, %v926_v21 }
 0x16b   : > { %5814 = vmatmul.mubr.f32.vlgmr.msra.gmra.mrb[0].mxu1 %v918_v24  ;;  %v938_v30 = vand.u32 4294901760, %v937_v27 }
 0x16c   : > { %6452 = vmatpush3.bf16.msra.mxu1 %v7619_v33  ;;  %v928_v29 = vand.u32 4294901760, %v927_v28 }
 0x16d   : > { %6454 = vmatprep.subr.bf16.mxu1 %v7723_v2 }
 0x16e   : > { %5816 = vmatprep.mubr.f32.mxu1 %v928_v29 }
 0x16f   : > { %5817 = vmatmul.mubr.f32.gmra.mrb[2].mxu1 %v938_v30 }
 0x170   : > { %6456 = vmatpush3.bf16.msra.mxu1 %v7723_v2  ;;  %5827 = vmatprep.mubr.f32.mxu1 %v7709_v3 }
 0x171   : > { %6458 = vmatprep.subr.bf16.mxu1 %v7634_v53 }
 0x173   : > { %5828 = vmatmul.mubr.f32.vlgmr.msra.gmra.mrb[0].mxu1 %v7706_v15 }
 0x174   : > { %6460 = vmatpush3.bf16.msra.mxu1 %v7634_v53  ;;  %5830 = vmatprep.mubr.f32.mxu1 %v7719_v0 }
 0x175   : > { %6462 = vmatprep.subr.bf16.mxu1 %v7732_v31 }
 0x177   : > { %5831 = vmatmul.mubr.f32.gmra.mrb[2].mxu1 %v7716_v61 }
 0x178   : > { %6464 = vmatpush3.bf16.msra.mxu1 %v7732_v31  ;;  %5841 = vmatprep.mubr.f32.mxu1 %v905_v55 }
 0x179   : > { %6466 = vmatprep.subr.msk.bf16.mxu1 %vm7333_vm14, %v7105_v19 }
 0x17b   : > { %5842 = vmatmul.mubr.f32.vlgmr.msra.gmra.mrb[0].mxu1 %v915_v8 }
 0x17c   : > { %6468 = vmatpush3.bf16.msk.msra.mxu1 %vm7333_vm14, %v7105_v19  ;;  %5844 = vmatprep.mubr.f32.mxu1 %v925_v13 }
 0x17d   : > { %6470 = vmatprep.subr.msk.bf16.mxu1 %vm7573_vm5, %v7105_v19 }
 0x17f   : > { %5845 = vmatmul.mubr.f32.gmra.mrb[2].mxu1 %v935_v5 }
 0x180   : > { %6472 = vmatpush3.bf16.msk.msra.mxu1 %vm7573_vm5, %v7105_v19  ;;  %5855 = vmatprep.mubr.f32.mxu1 %v906_v4 }
 0x181   : > { %6474 = vmatprep.subr.bf16.mxu1 %v7653_v60 }
 0x183   : > { %5856 = vmatmul.mubr.f32.vlgmr.msra.gmra.mrb[0].mxu1 %v916_v58 }
 0x184   : > { %6476 = vmatpush3.bf16.msra.mxu1 %v7653_v60  ;;  %5858 = vmatprep.mubr.f32.mxu1 %v926_v21 }
 0x185   : > { %6478 = vmatprep.subr.bf16.mxu1 %v7753_v32 }
 0x187   : > { %5859 = vmatmul.mubr.f32.gmra.mrb[2].mxu1 %v936_v16 }
 0x188   : > { %6480 = vmatpush3.bf16.msra.mxu1 %v7753_v32  ;;  %5869 = vmatprep.mubr.f32.mxu1 %v7709_v3 }
 0x189   : > { %6482 = vmatprep.subr.msk.bf16.mxu1 %vm7333_vm14, %v7105_v19 }
 0x18b   : > { %5870 = vmatmul.mubr.f32.vlgmr.msra.gmra.mrb[0].mxu1 %v7706_v15 }
 0x18c   : > { %6484 = vmatpush3.bf16.msk.msra.mxu1 %vm7333_vm14, %v7105_v19  ;;  %5872 = vmatprep.mubr.f32.mxu1 %v7719_v0 }
 0x18d   : > { %v5969_v20 = vpop.f32.mrb[4].mxu0  ;;  %6486 = vmatprep.subr.msk.bf16.mxu1 %vm7573_vm5, %v7105_v19 }
 0x18e   : > { %v2056_v25 = vsel %vm200_vm0, %v5969_v20, 0  ;;  %v2030_v26 = vpop.f32.mrb[5].mxu0 }
 0x18f   : > { %v7771_v36 = vand.u32 4294901760, %v2056_v25  ;;  %v2053_v37 = vsel %vm200_vm0, %v2030_v26, 0  ;;  %5873 = vmatmul.mubr.f32.gmra.mrb[2].mxu1 %v7716_v61 }
 0x190   : > { %v7775_v39 = vand.u32 4294901760, %v2053_v37  ;;  %6488 = vmatpush3.bf16.msk.msra.mxu1 %vm7573_vm5, %v7105_v19  ;;  %5883 = vmatprep.mubr.f32.mxu1 %v7709_v3 }
 0x191   : > { %v2140_v40 = vsub.f32 %v2056_v25, %v7771_v36  ;;  %v5972_v42 = vpop.f32.mrb[6].mxu0  ;;  %6538 = vmatprep.subr.msk.bf16.mxu1 %vm7333_vm14, %v7105_v19 }
 0x192   : > { %v2130_v45 = vsub.f32 %v2053_v37, %v7775_v39  ;;  %v2062_v49 = vsel %vm200_vm0, %v5972_v42, 0  ;;  %v2042_v51 = vpop.f32.mrb[7].mxu0 }
 0x193   : > { %v2141_v18 = vand.u32 4294901760, %v2140_v40  ;;  %v7787_v52 = vand.u32 4294901760, %v2062_v49  ;;  %v2059_v54 = vsel %vm200_vm0, %v2042_v51, 0  ;;  %5884 = vmatmul.mubr.f32.vlgmr.msra.gmra.mrb[0].mxu1 %v7706_v15 }
 0x194   : > { %v2131_v59 = vand.u32 4294901760, %v2130_v45  ;;  %v7791_v11 = vand.u32 4294901760, %v2059_v54  ;;  %6540 = vmatpush3.bf16.msk.msra.mxu1 %vm7333_vm14, %v7105_v19  ;;  %5886 = vmatprep.mubr.f32.mxu1 %v7719_v0 }
 0x195   : > { %v2142_v41 = vsub.f32 %v2140_v40, %v2141_v18  ;;  %v2160_v44 = vsub.f32 %v2062_v49, %v7787_v52  ;;  %6542 = vmatprep.subr.msk.bf16.mxu1 %vm7573_vm5, %v7105_v19 }
 0x196   : > { %v2150_v46 = vsub.f32 %v2059_v54, %v7791_v11  ;;  %v2132_v35 = vsub.f32 %v2130_v45, %v2131_v59 }
 0x197   : > { %v2161_v47 = vand.u32 4294901760, %v2160_v44  ;;  %5887 = vmatmul.mubr.f32.gmra.mrb[2].mxu1 %v7716_v61  ;;  %v2143_v57 = vand.u32 4294901760, %v2142_v41 }
 0x198   : > { %v2151_v38 = vand.u32 4294901760, %v2150_v46  ;;  %6544 = vmatpush3.bf16.msk.msra.mxu1 %vm7573_vm5, %v7105_v19  ;;  %v2133_v50 = vand.u32 4294901760, %v2132_v35 }
 0x199   : > { %6546 = vmatprep.subr.bf16.mxu1 %v7619_v33  ;;  %v2162_v63 = vsub.f32 %v2160_v44, %v2161_v47 }
 0x19a   : > { %5981 = vmatprep.mubr.f32.mxu1 %v2133_v50  ;;  %v2152_v10 = vsub.f32 %v2150_v46, %v2151_v38 }
 0x19b   : > { %5982 = vmatmul.mubr.f32.vlgmr.msra.gmra.mrb[4].mxu1 %v2143_v57  ;;  %v2163_v7 = vand.u32 4294901760, %v2162_v63 }
 0x19c   : > { %6548 = vmatpush3.bf16.msra.mxu1 %v7619_v33  ;;  %v2153_v15 = vand.u32 4294901760, %v2152_v10 }
 0x19d   : > { %6550 = vmatprep.subr.bf16.mxu1 %v7723_v2 }
 0x19e   : > { %5984 = vmatprep.mubr.f32.mxu1 %v2153_v15 }
 0x19f   : > { %5985 = vmatmul.mubr.f32.gmra.mrb[6].mxu1 %v2163_v7 }
 0x1a0   : > { %6552 = vmatpush3.bf16.msra.mxu1 %v7723_v2  ;;  %5995 = vmatprep.mubr.f32.mxu1 %v7775_v39 }
 0x1a1   : > { %6554 = vmatprep.subr.bf16.mxu1 %v7634_v53 }
 0x1a3   : > { %5996 = vmatmul.mubr.f32.vlgmr.msra.gmra.mrb[4].mxu1 %v7771_v36 }
 0x1a4   : > { %6556 = vmatpush3.bf16.msra.mxu1 %v7634_v53  ;;  %5998 = vmatprep.mubr.f32.mxu1 %v7791_v11 }
 0x1a5   : > { %6558 = vmatprep.subr.bf16.mxu1 %v7732_v31 }
 0x1a7   : > { %5999 = vmatmul.mubr.f32.gmra.mrb[6].mxu1 %v7787_v52 }
 0x1a8   : > { %6560 = vmatpush3.bf16.msra.mxu1 %v7732_v31  ;;  %6009 = vmatprep.mubr.f32.mxu1 %v2130_v45 }
 0x1a9   : > { %6562 = vmatprep.subr.msk.bf16.mxu1 %vm7333_vm14, %v7105_v19 }
 0x1ab   : > { %6010 = vmatmul.mubr.f32.vlgmr.msra.gmra.mrb[4].mxu1 %v2140_v40 }
 0x1ac   : > { %6564 = vmatpush3.bf16.msk.msra.mxu1 %vm7333_vm14, %v7105_v19  ;;  %6012 = vmatprep.mubr.f32.mxu1 %v2150_v46 }
 0x1ad   : > { %6566 = vmatprep.subr.msk.bf16.mxu1 %vm7573_vm5, %v7105_v19 }
 0x1af   : > { %6013 = vmatmul.mubr.f32.gmra.mrb[6].mxu1 %v2160_v44 }
 0x1b0   : > { %6568 = vmatpush3.bf16.msk.msra.mxu1 %vm7573_vm5, %v7105_v19  ;;  %6023 = vmatprep.mubr.f32.mxu1 %v2131_v59 }
 0x1b1   : > { %6570 = vmatprep.subr.bf16.mxu1 %v7653_v60 }
 0x1b3   : > { %6024 = vmatmul.mubr.f32.vlgmr.msra.gmra.mrb[4].mxu1 %v2141_v18 }
 0x1b4   : > { %6572 = vmatpush3.bf16.msra.mxu1 %v7653_v60  ;;  %6026 = vmatprep.mubr.f32.mxu1 %v2151_v38 }
 0x1b5   : > { %6574 = vmatprep.subr.bf16.mxu1 %v7753_v32 }
 0x1b7   : > { %6027 = vmatmul.mubr.f32.gmra.mrb[6].mxu1 %v2161_v47 }
 0x1b8   : > { %6576 = vmatpush3.bf16.msra.mxu1 %v7753_v32  ;;  %6037 = vmatprep.mubr.f32.mxu1 %v7775_v39 }
 0x1b9   : > { %6578 = vmatprep.subr.msk.bf16.mxu1 %vm7333_vm14, %v7105_v19 }
 0x1bb   : > { %6038 = vmatmul.mubr.f32.vlgmr.msra.gmra.mrb[4].mxu1 %v7771_v36 }
 0x1bc   : > { %6580 = vmatpush3.bf16.msk.msra.mxu1 %vm7333_vm14, %v7105_v19  ;;  %6040 = vmatprep.mubr.f32.mxu1 %v7791_v11 }
 0x1bd   : > { %v6137_v3 = vpop.f32.mrb[8].mxu0  ;;  %6582 = vmatprep.subr.msk.bf16.mxu1 %vm7573_vm5, %v7105_v19 }
 0x1be   : > { %v3282_v8 = vsel %vm200_vm0, %v6137_v3, 0  ;;  %v3256_v34 = vpop.f32.mrb[9].mxu0 }
 0x1bf   : > { %v7847_v43 = vand.u32 4294901760, %v3282_v8  ;;  %v3279_v17 = vsel %vm200_vm0, %v3256_v34, 0  ;;  %6041 = vmatmul.mubr.f32.gmra.mrb[6].mxu1 %v7787_v52 }
 0x1c0   : > { %v7851_v55 = vand.u32 4294901760, %v3279_v17  ;;  %6584 = vmatpush3.bf16.msk.msra.mxu1 %vm7573_vm5, %v7105_v19  ;;  %6051 = vmatprep.mubr.f32.mxu1 %v7775_v39 }
 0x1c1   : > { %v3366_v22 = vsub.f32 %v3282_v8, %v7847_v43  ;;  %v6140_v56 = vpop.f32.mrb[10].mxu0  ;;  %6634 = vmatprep.subr.msk.bf16.mxu1 %vm7333_vm14, %v7105_v19 }
 0x1c2   : > { %v3356_v58 = vsub.f32 %v3279_v17, %v7851_v55  ;;  %v3288_v61 = vsel %vm200_vm0, %v6140_v56, 0  ;;  %v3268_v62 = vpop.f32.mrb[11].mxu0 }
 0x1c3   : > { %v3367_v0 = vand.u32 4294901760, %v3366_v22  ;;  %v7863_v4 = vand.u32 4294901760, %v3288_v61  ;;  %v3285_v5 = vsel %vm200_vm0, %v3268_v62, 0  ;;  %6052 = vmatmul.mubr.f32.vlgmr.msra.gmra.mrb[4].mxu1 %v7771_v36 }
 0x1c4   : > { %v3357_v6 = vand.u32 4294901760, %v3356_v58  ;;  %v7867_v9 = vand.u32 4294901760, %v3285_v5  ;;  %6636 = vmatpush3.bf16.msk.msra.mxu1 %vm7333_vm14, %v7105_v19  ;;  %6054 = vmatprep.mubr.f32.mxu1 %v7791_v11 }
 0x1c5   : > { %v3368_v12 = vsub.f32 %v3366_v22, %v3367_v0  ;;  %v3386_v13 = vsub.f32 %v3288_v61, %v7863_v4  ;;  %6638 = vmatprep.subr.msk.bf16.mxu1 %vm7573_vm5, %v7105_v19 }
 0x1c6   : > { %v3376_v14 = vsub.f32 %v3285_v5, %v7867_v9  ;;  %v3358_v16 = vsub.f32 %v3356_v58, %v3357_v6 }
 0x1c7   : > { %v3387_v21 = vand.u32 4294901760, %v3386_v13  ;;  %6055 = vmatmul.mubr.f32.gmra.mrb[6].mxu1 %v7787_v52  ;;  %v3369_v27 = vand.u32 4294901760, %v3368_v12 }
 0x1c8   : > { %v3377_v23 = vand.u32 4294901760, %v3376_v14  ;;  %6640 = vmatpush3.bf16.msk.msra.mxu1 %vm7573_vm5, %v7105_v19  ;;  %v3359_v24 = vand.u32 4294901760, %v3358_v16 }
 0x1c9   : > { %6642 = vmatprep.subr.bf16.mxu1 %v7619_v33  ;;  %v3388_v28 = vsub.f32 %v3386_v13, %v3387_v21 }
 0x1ca   : > { %6149 = vmatprep.mubr.f32.mxu1 %v3359_v24  ;;  %v3378_v29 = vsub.f32 %v3376_v14, %v3377_v23 }
 0x1cb   : > { %6150 = vmatmul.mubr.f32.vlgmr.msra.gmra.mrb[8].mxu1 %v3369_v27  ;;  %v3389_v20 = vand.u32 4294901760, %v3388_v28 }
 0x1cc   : > { %6644 = vmatpush3.bf16.msra.mxu1 %v7619_v33  ;;  %v3379_v30 = vand.u32 4294901760, %v3378_v29 }
 0x1cd   : > { %6646 = vmatprep.subr.bf16.mxu1 %v7723_v2 }
 0x1ce   : > { %6152 = vmatprep.mubr.f32.mxu1 %v3379_v30 }
 0x1cf   : > { %6153 = vmatmul.mubr.f32.gmra.mrb[10].mxu1 %v3389_v20 }
 0x1d0   : > { %6648 = vmatpush3.bf16.msra.mxu1 %v7723_v2  ;;  %6163 = vmatprep.mubr.f32.mxu1 %v7851_v55 }
 0x1d1   : > { %6650 = vmatprep.subr.bf16.mxu1 %v7634_v53 }
 0x1d3   : > { %6164 = vmatmul.mubr.f32.vlgmr.msra.gmra.mrb[8].mxu1 %v7847_v43 }
 0x1d4   : > { %6652 = vmatpush3.bf16.msra.mxu1 %v7634_v53  ;;  %6166 = vmatprep.mubr.f32.mxu1 %v7867_v9 }
 0x1d5   : > { %6654 = vmatprep.subr.bf16.mxu1 %v7732_v31 }
 0x1d7   : > { %6167 = vmatmul.mubr.f32.gmra.mrb[10].mxu1 %v7863_v4 }
 0x1d8   : > { %6656 = vmatpush3.bf16.msra.mxu1 %v7732_v31  ;;  %6177 = vmatprep.mubr.f32.mxu1 %v3356_v58 }
 0x1d9   : > { %6658 = vmatprep.subr.msk.bf16.mxu1 %vm7333_vm14, %v7105_v19 }
 0x1db   : > { %6178 = vmatmul.mubr.f32.vlgmr.msra.gmra.mrb[8].mxu1 %v3366_v22 }
 0x1dc   : > { %6660 = vmatpush3.bf16.msk.msra.mxu1 %vm7333_vm14, %v7105_v19  ;;  %6180 = vmatprep.mubr.f32.mxu1 %v3376_v14 }
 0x1dd   : > { %6662 = vmatprep.subr.msk.bf16.mxu1 %vm7573_vm5, %v7105_v19 }
 0x1df   : > { %6181 = vmatmul.mubr.f32.gmra.mrb[10].mxu1 %v3386_v13 }
 0x1e0   : > { %6664 = vmatpush3.bf16.msk.msra.mxu1 %vm7573_vm5, %v7105_v19  ;;  %6191 = vmatprep.mubr.f32.mxu1 %v3357_v6 }
 0x1e1   : > { %6666 = vmatprep.subr.bf16.mxu1 %v7653_v60 }
 0x1e3   : > { %6192 = vmatmul.mubr.f32.vlgmr.msra.gmra.mrb[8].mxu1 %v3367_v0 }
 0x1e4   : > { %6668 = vmatpush3.bf16.msra.mxu1 %v7653_v60  ;;  %6194 = vmatprep.mubr.f32.mxu1 %v3377_v23 }
 0x1e5   : > { %6670 = vmatprep.subr.bf16.mxu1 %v7753_v32 }
 0x1e7   : > { %6195 = vmatmul.mubr.f32.gmra.mrb[10].mxu1 %v3387_v21 }
 0x1e8   : > { %6672 = vmatpush3.bf16.msra.mxu1 %v7753_v32  ;;  %6205 = vmatprep.mubr.f32.mxu1 %v7851_v55 }
 0x1e9   : > { %6674 = vmatprep.subr.msk.bf16.mxu1 %vm7333_vm14, %v7105_v19 }
 0x1eb   : > { %6206 = vmatmul.mubr.f32.vlgmr.msra.gmra.mrb[8].mxu1 %v7847_v43 }
 0x1ec   : > { %6676 = vmatpush3.bf16.msk.msra.mxu1 %vm7333_vm14, %v7105_v19  ;;  %6208 = vmatprep.mubr.f32.mxu1 %v7867_v9 }
 0x1ed   : > { %v6305_v25 = vpop.f32.mrb[12].mxu0  ;;  %6678 = vmatprep.subr.msk.bf16.mxu1 %vm7573_vm5, %v7105_v19 }
 0x1ee   : > { %v4508_v26 = vsel %vm200_vm0, %v6305_v25, 0  ;;  %v4482_v36 = vpop.f32.mrb[13].mxu0 }
 0x1ef   : > { %v7923_v37 = vand.u32 4294901760, %v4508_v26  ;;  %v4505_v39 = vsel %vm200_vm0, %v4482_v36, 0  ;;  %6209 = vmatmul.mubr.f32.gmra.mrb[10].mxu1 %v7863_v4 }
 0x1f0   : > { %v7927_v40 = vand.u32 4294901760, %v4505_v39  ;;  %6680 = vmatpush3.bf16.msk.msra.mxu1 %vm7573_vm5, %v7105_v19  ;;  %6219 = vmatprep.mubr.f32.mxu1 %v7851_v55 }
 0x1f1   : > { %v4592_v42 = vsub.f32 %v4508_v26, %v7923_v37  ;;  %v6308_v45 = vpop.f32.mrb[14].mxu0  ;;  %6730 = vmatprep.subr.msk.bf16.mxu1 %vm7333_vm14, %v7105_v19 }
 0x1f2   : > { %v4582_v49 = vsub.f32 %v4505_v39, %v7927_v40  ;;  %v4514_v51 = vsel %vm200_vm0, %v6308_v45, 0  ;;  %v4494_v18 = vpop.f32.mrb[15].mxu0 }
 0x1f3   : > { %v4593_v52 = vand.u32 4294901760, %v4592_v42  ;;  %v7939_v54 = vand.u32 4294901760, %v4514_v51  ;;  %v4511_v59 = vsel %vm200_vm0, %v4494_v18, 0  ;;  %6220 = vmatmul.mubr.f32.vlgmr.msra.gmra.mrb[8].mxu1 %v7847_v43 }
 0x1f4   : > { %v4583_v11 = vand.u32 4294901760, %v4582_v49  ;;  %v4601_v41 = vand.u32 4294901760, %v4511_v59  ;;  %6732 = vmatpush3.bf16.msk.msra.mxu1 %vm7333_vm14, %v7105_v19  ;;  %6222 = vmatprep.mubr.f32.mxu1 %v7867_v9 }
 0x1f5   : > { %v4594_v44 = vsub.f32 %v4592_v42, %v4593_v52  ;;  %v4612_v46 = vsub.f32 %v4514_v51, %v7939_v54  ;;  %6734 = vmatprep.subr.msk.bf16.mxu1 %vm7573_vm5, %v7105_v19 }
 0x1f6   : > { %v4602_v35 = vsub.f32 %v4511_v59, %v4601_v41  ;;  %v4584_v47 = vsub.f32 %v4582_v49, %v4583_v11 }
 0x1f7   : > { %v4613_v38 = vand.u32 4294901760, %v4612_v46  ;;  %6223 = vmatmul.mubr.f32.gmra.mrb[10].mxu1 %v7863_v4  ;;  %v4595_v63 = vand.u32 4294901760, %v4594_v44 }
 0x1f8   : > { %v4603_v50 = vand.u32 4294901760, %v4602_v35  ;;  %6736 = vmatpush3.bf16.msk.msra.mxu1 %vm7573_vm5, %v7105_v19  ;;  %v4585_v57 = vand.u32 4294901760, %v4584_v47 }
 0x1f9   : > { %6738 = vmatprep.subr.bf16.mxu1 %v7619_v33  ;;  %v4614_v10 = vsub.f32 %v4612_v46, %v4613_v38 }
 0x1fa   : > { %6317 = vmatprep.mubr.f32.mxu1 %v4585_v57  ;;  %v4604_v15 = vsub.f32 %v4602_v35, %v4603_v50 }
 0x1fb   : > { %6318 = vmatmul.mubr.f32.vlgmr.msra.gmra.mrb[12].mxu1 %v4595_v63  ;;  %v4615_v3 = vand.u32 4294901760, %v4614_v10 }
 0x1fc   : > { %6740 = vmatpush3.bf16.msra.mxu1 %v7619_v33  ;;  %v4605_v7 = vand.u32 4294901760, %v4604_v15 }
 0x1fd   : > { %6742 = vmatprep.subr.bf16.mxu1 %v7723_v2 }
 0x1fe   : > { %6320 = vmatprep.mubr.f32.mxu1 %v4605_v7 }
 0x1ff   : > { %6321 = vmatmul.mubr.f32.gmra.mrb[14].mxu1 %v4615_v3 }
 0x200   : > { %6744 = vmatpush3.bf16.msra.mxu1 %v7723_v2  ;;  %6331 = vmatprep.mubr.f32.mxu1 %v7927_v40 }
 0x201   : > { %6746 = vmatprep.subr.bf16.mxu1 %v7634_v53 }
 0x203   : > { %6332 = vmatmul.mubr.f32.vlgmr.msra.gmra.mrb[12].mxu1 %v7923_v37 }
 0x204   : > { %6748 = vmatpush3.bf16.msra.mxu1 %v7634_v53  ;;  %6334 = vmatprep.mubr.f32.mxu1 %v4601_v41 }
 0x205   : > { %6750 = vmatprep.subr.bf16.mxu1 %v7732_v31 }
 0x207   : > { %6335 = vmatmul.mubr.f32.gmra.mrb[14].mxu1 %v7939_v54 }
 0x208   : > { %6752 = vmatpush3.bf16.msra.mxu1 %v7732_v31  ;;  %6345 = vmatprep.mubr.f32.mxu1 %v4582_v49 }
 0x209   : > { %6754 = vmatprep.subr.msk.bf16.mxu1 %vm7333_vm14, %v7105_v19 }
 0x20b   : > { %6346 = vmatmul.mubr.f32.vlgmr.msra.gmra.mrb[12].mxu1 %v4592_v42 }
 0x20c   : > { %6756 = vmatpush3.bf16.msk.msra.mxu1 %vm7333_vm14, %v7105_v19  ;;  %6348 = vmatprep.mubr.f32.mxu1 %v4602_v35 }
 0x20d   : > { %6758 = vmatprep.subr.msk.bf16.mxu1 %vm7573_vm5, %v7105_v19 }
 0x20f   : > { %6349 = vmatmul.mubr.f32.gmra.mrb[14].mxu1 %v4612_v46 }
 0x210   : > { %6760 = vmatpush3.bf16.msk.msra.mxu1 %vm7573_vm5, %v7105_v19  ;;  %6359 = vmatprep.mubr.f32.mxu1 %v4583_v11 }
 0x211   : > { %6762 = vmatprep.subr.bf16.mxu1 %v7653_v60 }
 0x213   : > { %6360 = vmatmul.mubr.f32.vlgmr.msra.gmra.mrb[12].mxu1 %v4593_v52 }
 0x214   : > { %6764 = vmatpush3.bf16.msra.mxu1 %v7653_v60  ;;  %6362 = vmatprep.mubr.f32.mxu1 %v4603_v50 }
 0x215   : > { %6766 = vmatprep.subr.bf16.mxu1 %v7753_v32 }
 0x217   : > { %6363 = vmatmul.mubr.f32.gmra.mrb[14].mxu1 %v4613_v38 }
 0x218   : > { %6768 = vmatpush3.bf16.msra.mxu1 %v7753_v32  ;;  %6373 = vmatprep.mubr.f32.mxu1 %v7927_v40 }
 0x219   : > { %6770 = vmatprep.subr.msk.bf16.mxu1 %vm7333_vm14, %v7105_v19 }
 0x21b   : > { %6374 = vmatmul.mubr.f32.vlgmr.msra.gmra.mrb[12].mxu1 %v7923_v37 }
 0x21c   : > { %6772 = vmatpush3.bf16.msk.msra.mxu1 %vm7333_vm14, %v7105_v19  ;;  %6376 = vmatprep.mubr.f32.mxu1 %v4601_v41 }
 0x21d   : > { %6774 = vmatprep.subr.msk.bf16.mxu1 %vm7573_vm5, %v7105_v19 }
 0x21f   : > { %6377 = vmatmul.mubr.f32.gmra.mrb[14].mxu1 %v7939_v54 }
 0x220   : > { %6776 = vmatpush3.bf16.msk.msra.mxu1 %vm7573_vm5, %v7105_v19  ;;  %6387 = vmatprep.mubr.f32.mxu1 %v7927_v40 }
 0x223   : > { %6388 = vmatmul.mubr.f32.vlgmr.msra.gmra.mrb[12].mxu1 %v7923_v37 }
 0x224   : > { %6390 = vmatprep.mubr.f32.mxu1 %v4601_v41 }
 0x227   : > { %6391 = vmatmul.mubr.f32.gmra.mrb[14].mxu1 %v7939_v54 }
 0x266   : > { %v5885_v48 = vpop.f32.mrb[0].mxu1 }
 0x267   : > { %1430 = vst.msk [vmem:[%s8002_s16 + $0x8] sm:$0xff] %vm200_vm0, %v5885_v48  ;;  %v1407_v1 = vpop.f32.mrb[1].mxu1 }
 0x268   : > { %1429 = vst.msk [vmem:[%s8002_s16] sm:$0xff] %vm200_vm0, %v1407_v1 }
 0x26a   : > { %v5888_v19 = vpop.f32.mrb[2].mxu1 }
 0x26b   : > { %1432 = vst.msk [vmem:[%s8002_s16 + $0x18] sm:$0xff] %vm200_vm0, %v5888_v19  ;;  %v1419_v33 = vpop.f32.mrb[3].mxu1 }
 0x26c   : > { %1431 = vst.msk [vmem:[%s8002_s16 + $0x10] sm:$0xff] %vm200_vm0, %v1419_v33 }
 0x296   : > { %v6053_v53 = vpop.f32.mrb[4].mxu1 }
 0x297   : > { %5263 = vst.msk [vmem:[%s8002_s16 + $0x28] sm:$0xff] %vm200_vm0, %v6053_v53  ;;  %v2632_v60 = vpop.f32.mrb[5].mxu1 }
 0x298   : > { %5262 = vst.msk [vmem:[%s8002_s16 + $0x20] sm:$0xff] %vm200_vm0, %v2632_v60 }
 0x29a   : > { %v6056_v2 = vpop.f32.mrb[6].mxu1 }
 0x29b   : > { %5265 = vst.msk [vmem:[%s8002_s16 + $0x38] sm:$0xff] %vm200_vm0, %v6056_v2  ;;  %v2644_v31 = vpop.f32.mrb[7].mxu1 }
 0x29c   : > { %5264 = vst.msk [vmem:[%s8002_s16 + $0x30] sm:$0xff] %vm200_vm0, %v2644_v31 }
 0x2c6   : > { %v6221_v32 = vpop.f32.mrb[8].mxu1 }
 0x2c7   : > { %5295 = vst.msk [vmem:[%s8002_s16 + $0x48] sm:$0xff] %vm200_vm0, %v6221_v32  ;;  %v3858_v8 = vpop.f32.mrb[9].mxu1 }
 0x2c8   : > { %5294 = vst.msk [vmem:[%s8002_s16 + $0x40] sm:$0xff] %vm200_vm0, %v3858_v8 }
 0x2ca   : > { %v6224_v34 = vpop.f32.mrb[10].mxu1 }
 0x2cb   : > { %5297 = vst.msk [vmem:[%s8002_s16 + $0x58] sm:$0xff] %vm200_vm0, %v6224_v34  ;;  %v3870_v43 = vpop.f32.mrb[11].mxu1 }
 0x2cc   : > { %5296 = vst.msk [vmem:[%s8002_s16 + $0x50] sm:$0xff] %vm200_vm0, %v3870_v43 }
 0x2f6   : > { %v6389_v17 = vpop.f32.mrb[12].mxu1 }
 0x2f7   : > { %5327 = vst.msk [vmem:[%s8002_s16 + $0x68] sm:$0xff] %vm200_vm0, %v6389_v17  ;;  %v5084_v55 = vpop.f32.mrb[13].mxu1 }
 0x2f8   : > { %5326 = vst.msk [vmem:[%s8002_s16 + $0x60] sm:$0xff] %vm200_vm0, %v5084_v55 }
 0x2fa   : > { %v6392_v22 = vpop.f32.mrb[14].mxu1 }
 0x2fb   : > { %5329 = vst.msk [vmem:[%s8002_s16 + $0x78] sm:$0xff] %vm200_vm0, %v6392_v22  ;;  %v5096_v56 = vpop.f32.mrb[15].mxu1 }
 0x2fc   : > { %5328 = vst.msk [vmem:[%s8002_s16 + $0x70] sm:$0xff] %vm200_vm0, %v5096_v56 }
 0x2fd   : > { %7043 = shalt.err (!%p7040_p5)
}
 0x2fe   : > { %s7044_s8 = scalar_lea.hbm %s8037_s26, 2048  ;;  %s7048_s9 = scalar_lea.hbm %s8089_s2, 4096 }
 0x2ff   : > { %p7045_p7 = scmp.ne.s32.totalorder %s8037_s26, %s7044_s8  ;;  %p7049_p12 = scmp.lt.u32.totalorder %s8037_s26, %s8089_s2 }
 0x300   : > { %p7050_p4 = scmp.lt.u32.totalorder %s7048_s9, %s7044_s8  ;;  %p7052_p9 = scmp.lt.u32.totalorder %s7044_s8, %s8037_s26 }
 0x301   : > { %p7046_p8 = pnand %p7045_p7, %p8100_p0 }
 0x302   : > { %p7051_p6 = por %p7050_p4, %p7049_p12 }
 0x303   : > { %p7047_p10 = pneg %p7046_p8 }
 0x304   : > { %p7053_p1 = por %p7052_p9, %p7051_p6 }
 0x306   : > { %p7054_p2 = pnand %p7053_p1, %p7047_p10 }
 0x308   : > { %7057 = shalt.err (!%p7054_p2)
}
 0x309   : > { %s7107_s13 = smov 128   ;;  %s7108_s29 = smov 8  }
 0x30a   : > { %6939 = dma.vmem_to_hbm [thread:$0]  (%p8100_p0), %s8039_s18, 2048, %s8037_s26, %s5112_s0, %s7107_s13, %s7107_s13, %s7108_s29  }
 0x30b PF: > { %s5140_s15 = sand.u32 1, %s7086_s19   ;;  %p8101_p11 = scmp.ne.s32.totalorder %s8094_s3, 0 }
 0x30c   : > { %p8102_p13 = scmp.ge.s32.totalorder %s7098_s22, 2  ;;  %s5141_s16 = scalar_lea.sflag [#allocation6], %s5140_s15 }
 0x30e   : > { %p6946_p3 = pnand %p8102_p13, %p8101_p11 }
 0x310   : > { %7081 = dma.done.wait (!%p6946_p3), %s5141_s16, 2048  }
 0x311   : > { %7083 = vsyncadd (!%p6946_p3), %s5141_s16, 4294965248  ;;  %p19_p5 = scmp.ge.s32.totalorder %s7161_s24, 4   ;;  %s8103_s19 = smov %s7090_s20 }
 0x312   : > { %s8104_s20 = smov %s7094_s21  ;;  %s8105_s21 = smov %s7173_s27 }
 0x313   : > { %s8106_s22 = smov %s7161_s24  ;;  %21 = sbr.rel (!%p19_p5) target bundleno = 17 (0x11), region = 75 }
 0x31a   :  { %5146 = vsyncpa [#allocation5], 1 }
 0x31b   :  { %5148 = vsyncpa [#allocation5 + $0x1], 1 }
 0x31c   :  { %5149 = vsyncpa [#allocation6], 1 }
 0x31d   :  { %5151 = vsyncpa [#allocation6 + $0x1], 1 }

</bundles_post_ra>
